<compile_context>
chip_gen: v7x
topology: tpu7x:2x2x1
jax: 0.10.0
libtpu: 0.0.40
codegen_flags: <defaults>
</compile_context>

<pallas_src>
import jax
import jax.numpy as jnp
from jax import lax
from jax.experimental import pallas as pl
from jax.experimental.pallas import tpu as pltpu

# ---------------- config ----------------
VOCAB = 50
EMB = 16            # embedding_size
HID = 32            # hidden_size (unidirectional -> hidden_dim == HID)
T = 8               # max_len == sequence length
B = 2               # batch
NUM_CLASSES = 4
GATE = 4 * HID      # 128 — exactly one lane-tile wide
LANE = 128          # lane-dense padded output width


def _round_up(x, m):
    return (x + m - 1) // m * m


def _tree_reduce(xs, op):
    """Pairwise (log-depth) reduction of a Python list of traced arrays."""
    xs = list(xs)
    while len(xs) > 1:
        nxt = [op(xs[i], xs[i + 1]) for i in range(0, len(xs) - 1, 2)]
        if len(xs) % 2:
            nxt.append(xs[-1])
        xs = nxt
    return xs[0]


# ---------------- Pallas kernel ----------------
def lstm_attn_classify_kernel(tok_ref,      # (Bblk, T)        token ids (int32)
                              table_ref,    # (VOCAB_pad, 4H)  emb_table @ W_ih^T + (b_ih+b_hh)
                              whh_t_ref,    # (H, 4H)          W_hh^T
                              w_attn_ref,   # (1, H)           attention vector W^T
                              wcls_t_ref,   # (H, 128)         classifier weight^T, zero-padded
                              bcls_ref,     # (1, 128)         classifier bias, zero-padded
                              logits_ref):  # (Bblk, 128)      lane-dense output
    B_, T_ = tok_ref.shape
    V_, _ = table_ref.shape
    H_ = whh_t_ref.shape[0]

    table = table_ref[...]                                     # (V, 4H)
    whh_t = whh_t_ref[...]                                     # (H, 4H)
    tok = tok_ref[...]                                         # (B, T) i32
    vocab_iota = lax.broadcasted_iota(jnp.int32, (B_, V_), 1)  # (B, V)

    h = jnp.zeros((B_, H_), jnp.float32)
    c = jnp.zeros((B_, H_), jnp.float32)
    hs = []            # per-step hidden states, register-resident

    # Static unroll: T is tiny and fixed.  The embedding-projection gather is
    # an in-kernel one-hot @ table MXU matmul (fills MXU slack next to the
    # serial h @ W_hh chain; no dynamic-sublane loads needed).
    for t in range(T_):
        onehot = (tok[:, t:t + 1] == vocab_iota).astype(jnp.float32)   # (B, V)
        x_gates = jnp.dot(onehot, table,
                          preferred_element_type=jnp.float32)          # (B, 4H)
        gates = x_gates + jnp.dot(h, whh_t,
                                  preferred_element_type=jnp.float32)
        # One sigmoid and one tanh over the full 128-lane gates vreg
        # (PyTorch gate order: i, f, g, o).
        sg = jax.nn.sigmoid(gates)
        th = jnp.tanh(gates)
        i_g = sg[:, 0 * H_:1 * H_]
        f_g = sg[:, 1 * H_:2 * H_]
        g_g = th[:, 2 * H_:3 * H_]
        o_g = sg[:, 3 * H_:4 * H_]
        c = f_g * c + i_g * g_g
        h = o_g * jnp.tanh(c)
        hs.append(h)

    # ---- attention scores in a second pass (off the recurrence crit-path) ----
    w_attn = w_attn_ref[...]                                   # (1, H)
    scores = [jnp.sum(jnp.tanh(ht) * w_attn, axis=-1, keepdims=True)
              for ht in hs]                                    # T x (B, 1)

    # ---- softmax over timesteps, tree-reduced (depth log2(T)) --------------
    m = _tree_reduce(scores, jnp.maximum)
    es = [jnp.exp(s - m) for s in scores]
    denom = _tree_reduce(es, lambda a, b: a + b)
    inv = pl.reciprocal(denom, approx=True)                    # EUP slot, ~free
    r = _tree_reduce([hs[t] * es[t] for t in range(T_)],
                     lambda a, b: a + b) * inv                 # (B, H)
    h_star = jnp.tanh(r)

    # Dropout is identity in eval mode.  Lane-dense (B, 128) store.
    logits_ref[...] = (jnp.dot(h_star, wcls_t_ref[...],
                               preferred_element_type=jnp.float32)
                       + bcls_ref[...])


# ---------------- wrapper ----------------
def lstm_classifier_forward(inputs, mask, params):
    """Forward pass: returns (logits, emb) like the PyTorch module."""
    del mask  # TODO(synk): attn=True branch of the PyTorch forward ignores the mask
    emb_table = params["embedding"].astype(jnp.float32)        # (VOCAB, E), row 0 == 0
    emb = emb_table[inputs]                                    # (B, T, E), second return

    # Hoist the input projection out of the recurrence: project the whole
    # embedding table once; the per-token gather happens inside the kernel.
    bias = (params["b_ih"] + params["b_hh"]).astype(jnp.float32)          # (4H,)
    proj_table = emb_table @ params["w_ih"].T.astype(jnp.float32) + bias  # (VOCAB, 4H)
    vocab_pad = _round_up(VOCAB, 8)
    proj_table = jnp.pad(proj_table, ((0, vocab_pad - VOCAB), (0, 0)))    # (Vpad, 4H)

    whh_t = params["w_hh"].T.astype(jnp.float32)               # (H, 4H)
    w_attn = params["W_attn"].reshape(1, -1).astype(jnp.float32)          # (1, H)
    # Zero-pad the classifier to a lane-dense 128-wide tile (unmasked stores).
    wcls_pad = jnp.zeros((HID, LANE), jnp.float32)
    wcls_pad = wcls_pad.at[:, :NUM_CLASSES].set(params["w_cls"].T.astype(jnp.float32))
    bcls_pad = jnp.zeros((1, LANE), jnp.float32)
    bcls_pad = bcls_pad.at[:, :NUM_CLASSES].set(params["b_cls"].astype(jnp.float32))

    Bt, T_ = inputs.shape
    # Pad the batch to a full sublane tile (multiple of 8).
    Bpad = max(8, _round_up(Bt, 8))
    if Bpad >= 16:
        # >= 2 "parallel" batch blocks so v7x's second TensorCore engages;
        # cap M at 128 rows (one MXU push on all generations).
        bblk = min(_round_up(pl.cdiv(Bpad, 2), 8), 128)
        Bpad = bblk * pl.cdiv(Bpad, bblk)
    else:
        bblk = Bpad
    tok = jnp.zeros((Bpad, T_), jnp.int32).at[:Bt].set(inputs.astype(jnp.int32))

    grid = (Bpad // bblk,)
    logits_pad = pl.pallas_call(
        lstm_attn_classify_kernel,
        out_shape=jax.ShapeDtypeStruct((Bpad, LANE), jnp.float32),
        grid=grid,
        in_specs=[
            pl.BlockSpec((bblk, T_), lambda i: (i, 0)),
            pl.BlockSpec((vocab_pad, GATE), lambda i: (0, 0)),
            pl.BlockSpec((HID, GATE), lambda i: (0, 0)),
            pl.BlockSpec((1, HID), lambda i: (0, 0)),
            pl.BlockSpec((HID, LANE), lambda i: (0, 0)),
            pl.BlockSpec((1, LANE), lambda i: (0, 0)),
        ],
        out_specs=pl.BlockSpec((bblk, LANE), lambda i: (i, 0)),
        compiler_params=pltpu.CompilerParams(
            dimension_semantics=("parallel",)),
    )(tok, proj_table, whh_t, w_attn, wcls_pad, bcls_pad)
    return logits_pad[:Bt, :NUM_CLASSES], emb


# ---------------- pure-JAX reference (sanity check) ----------------
def reference_forward(inputs, params):
    emb = params["embedding"][inputs]
    x_tbe = jnp.transpose(emb, (1, 0, 2)).astype(jnp.float32)
    wih_t, whh_t = params["w_ih"].T, params["w_hh"].T
    b = params["b_ih"] + params["b_hh"]

    def step(carry, x_t):
        h, c = carry
        gates = x_t @ wih_t + h @ whh_t + b
        i_g = jax.nn.sigmoid(gates[:, 0 * HID:1 * HID])
        f_g = jax.nn.sigmoid(gates[:, 1 * HID:2 * HID])
        g_g = jnp.tanh(gates[:, 2 * HID:3 * HID])
        o_g = jax.nn.sigmoid(gates[:, 3 * HID:4 * HID])
        c_new = f_g * c + i_g * g_g
        h_new = o_g * jnp.tanh(c_new)
        return (h_new, c_new), h_new

    h0 = jnp.zeros((inputs.shape[0], HID), jnp.float32)
    (_, _), outs = lax.scan(step, (h0, h0), x_tbe)             # (T, B, H)
    M = jnp.tanh(outs)
    scores = jnp.einsum("tbh,h->tb", M, params["W_attn"].reshape(-1))
    alpha = jax.nn.softmax(scores, axis=0)
    r = jnp.einsum("tbh,tb->bh", outs, alpha)
    h_star = jnp.tanh(r)
    return h_star @ params["w_cls"].T + params["b_cls"]


# ---------------- deterministic parameter init ----------------
def init_params(key):
    ks = jax.random.split(key, 8)
    s = 1.0 / jnp.sqrt(HID)
    emb = jax.random.normal(ks[0], (VOCAB, EMB), jnp.float32) * 0.1
    emb = emb.at[0].set(0.0)                                   # padding_idx=0
    return {
        "embedding": emb,
        "w_ih": jax.random.uniform(ks[1], (4 * HID, EMB), jnp.float32, -s, s),
        "w_hh": jax.random.uniform(ks[2], (4 * HID, HID), jnp.float32, -s, s),
        "b_ih": jax.random.uniform(ks[3], (4 * HID,), jnp.float32, -s, s),
        "b_hh": jax.random.uniform(ks[4], (4 * HID,), jnp.float32, -s, s),
        # PyTorch __init__ uses np.zeros((hidden_dim, 1)); small random values
        # here so the attention softmax is non-trivial (deterministic).
        "W_attn": jax.random.normal(ks[5], (HID, 1), jnp.float32) * 0.1,
        "w_cls": jax.random.uniform(ks[6], (NUM_CLASSES, HID), jnp.float32, -s, s),
        "b_cls": jax.random.uniform(ks[7], (NUM_CLASSES,), jnp.float32, -s, s),
    }


if __name__ == "__main__":
    key = jax.random.PRNGKey(0)
    k_param, k_tok = jax.random.split(key)
    params = init_params(k_param)

    inputs = jax.random.randint(k_tok, (B, T), 0, VOCAB, dtype=jnp.int32)  # token ids
    mask = (inputs != 0).astype(jnp.float32)                               # (B, T), unused in attn branch

    logits, emb = lstm_classifier_forward(inputs, mask, params)
    logits = jax.block_until_ready(logits)
    emb = jax.block_until_ready(emb)

    ref = reference_forward(inputs, params)
    assert logits.shape == (B, NUM_CLASSES) and emb.shape == (B, T, EMB)
    assert jnp.allclose(logits, ref, atol=2e-3, rtol=2e-3)
    print("KERNEL_OK")
</pallas_src>

<mosaic_0001>
module attributes {stable_mosaic.version = 11 : i64} {
  func.func @lstm_attn_classify_kernel(%arg0: i32, %arg1: memref<8x8xi32, #tpu.memory_space<vmem>>, %arg2: memref<56x128xf32, #tpu.memory_space<vmem>>, %arg3: memref<32x128xf32, #tpu.memory_space<vmem>>, %arg4: memref<1x32xf32, #tpu.memory_space<vmem>>, %arg5: memref<32x128xf32, #tpu.memory_space<vmem>>, %arg6: memref<1x128xf32, #tpu.memory_space<vmem>>, %arg7: memref<8x128xf32, #tpu.memory_space<vmem>>) attributes {dimension_semantics = [#tpu.dimension_semantics<parallel>], iteration_bounds = array<i64: 1>, scalar_prefetch = 0 : i64, scratch_operands = 0 : i64, tpu.core_type = #tpu.core_type<tc>, window_params = [{transform_indices = @transform_0, window_bounds = array<i64: 8, 8>}, {pipeline_mode = #tpu.pipeline_mode<synchronous>, transform_indices = @transform_1, window_bounds = array<i64: 56, 128>}, {pipeline_mode = #tpu.pipeline_mode<synchronous>, transform_indices = @transform_2, window_bounds = array<i64: 32, 128>}, {pipeline_mode = #tpu.pipeline_mode<synchronous>, transform_indices = @transform_3, window_bounds = array<i64: 1, 32>}, {pipeline_mode = #tpu.pipeline_mode<synchronous>, transform_indices = @transform_4, window_bounds = array<i64: 32, 128>}, {pipeline_mode = #tpu.pipeline_mode<synchronous>, transform_indices = @transform_5, window_bounds = array<i64: 1, 128>}, {transform_indices = @transform_6, window_bounds = array<i64: 8, 128>}]} {
    %c0 = arith.constant 0 : index
    %c0_0 = arith.constant 0 : index
    %0 = vector.load %arg2[%c0, %c0_0] : memref<56x128xf32, #tpu.memory_space<vmem>>, vector<56x128xf32>
    %c0_1 = arith.constant 0 : index
    %c0_2 = arith.constant 0 : index
    %1 = vector.load %arg3[%c0_1, %c0_2] : memref<32x128xf32, #tpu.memory_space<vmem>>, vector<32x128xf32>
    %c0_3 = arith.constant 0 : index
    %c0_4 = arith.constant 0 : index
    %2 = vector.load %arg1[%c0_3, %c0_4] : memref<8x8xi32, #tpu.memory_space<vmem>>, vector<8x8xi32>
    %3 = tpu.iota {dimensions = array<i32: 1>} : vector<8x56xi32>
    %cst = arith.constant 0.000000e+00 : f32
    %4 = vector.broadcast %cst : f32 to vector<8x32xf32>
    %cst_5 = arith.constant 0.000000e+00 : f32
    %5 = vector.broadcast %cst_5 : f32 to vector<8x32xf32>
    %6 = vector.extract_strided_slice %2 {offsets = [0, 0], sizes = [8, 1], strides = [1, 1]} : vector<8x8xi32> to vector<8x1xi32>
    %7 = vector.broadcast %6 : vector<8x1xi32> to vector<8x56xi32>
    %8 = arith.cmpi eq, %7, %3 : vector<8x56xi32>
    %9 = arith.extui %8 : vector<8x56xi1> to vector<8x56xi32>
    %10 = arith.sitofp %9 : vector<8x56xi32> to vector<8x56xf32>
    %cst_6 = arith.constant dense<0.000000e+00> : vector<8x128xf32>
    %11 = tpu.matmul %10, %0, %cst_6 {dimension_numbers = #tpu.dot_dimension_numbers<[1], [0], [0], [1], [0, 0, 1, 1], [], []>} : vector<8x56xf32>, vector<56x128xf32>, vector<8x128xf32> -> vector<8x128xf32>
    %cst_7 = arith.constant dense<0.000000e+00> : vector<8x128xf32>
    %12 = tpu.matmul %4, %1, %cst_7 {dimension_numbers = #tpu.dot_dimension_numbers<[1], [0], [0], [1], [0, 0, 1, 1], [], []>} : vector<8x32xf32>, vector<32x128xf32>, vector<8x128xf32> -> vector<8x128xf32>
    %13 = arith.addf %11, %12 : vector<8x128xf32>
    %14 = arith.negf %13 : vector<8x128xf32>
    %15 = math.exp %14 : vector<8x128xf32>
    %cst_8 = arith.constant 1.000000e+00 : f32
    %16 = vector.broadcast %cst_8 : f32 to vector<8x128xf32>
    %17 = arith.addf %16, %15 : vector<8x128xf32>
    %18 = arith.divf %16, %17 : vector<8x128xf32>
    %19 = math.tanh %13 : vector<8x128xf32>
    %20 = vector.extract_strided_slice %18 {offsets = [0, 0], sizes = [8, 32], strides = [1, 1]} : vector<8x128xf32> to vector<8x32xf32>
    %21 = vector.extract_strided_slice %18 {offsets = [0, 32], sizes = [8, 32], strides = [1, 1]} : vector<8x128xf32> to vector<8x32xf32>
    %22 = vector.extract_strided_slice %19 {offsets = [0, 64], sizes = [8, 32], strides = [1, 1]} : vector<8x128xf32> to vector<8x32xf32>
    %23 = vector.extract_strided_slice %18 {offsets = [0, 96], sizes = [8, 32], strides = [1, 1]} : vector<8x128xf32> to vector<8x32xf32>
    %24 = arith.mulf %21, %5 : vector<8x32xf32>
    %25 = arith.mulf %20, %22 : vector<8x32xf32>
    %26 = arith.addf %24, %25 : vector<8x32xf32>
    %27 = math.tanh %26 : vector<8x32xf32>
    %28 = arith.mulf %23, %27 : vector<8x32xf32>
    %29 = vector.extract_strided_slice %2 {offsets = [0, 1], sizes = [8, 1], strides = [1, 1]} : vector<8x8xi32> to vector<8x1xi32>
    %30 = vector.broadcast %29 : vector<8x1xi32> to vector<8x56xi32>
    %31 = arith.cmpi eq, %30, %3 : vector<8x56xi32>
    %32 = arith.extui %31 : vector<8x56xi1> to vector<8x56xi32>
    %33 = arith.sitofp %32 : vector<8x56xi32> to vector<8x56xf32>
    %cst_9 = arith.constant dense<0.000000e+00> : vector<8x128xf32>
    %34 = tpu.matmul %33, %0, %cst_9 {dimension_numbers = #tpu.dot_dimension_numbers<[1], [0], [0], [1], [0, 0, 1, 1], [], []>} : vector<8x56xf32>, vector<56x128xf32>, vector<8x128xf32> -> vector<8x128xf32>
    %cst_10 = arith.constant dense<0.000000e+00> : vector<8x128xf32>
    %35 = tpu.matmul %28, %1, %cst_10 {dimension_numbers = #tpu.dot_dimension_numbers<[1], [0], [0], [1], [0, 0, 1, 1], [], []>} : vector<8x32xf32>, vector<32x128xf32>, vector<8x128xf32> -> vector<8x128xf32>
    %36 = arith.addf %34, %35 : vector<8x128xf32>
    %37 = arith.negf %36 : vector<8x128xf32>
    %38 = math.exp %37 : vector<8x128xf32>
    %cst_11 = arith.constant 1.000000e+00 : f32
    %39 = vector.broadcast %cst_11 : f32 to vector<8x128xf32>
    %40 = arith.addf %39, %38 : vector<8x128xf32>
    %41 = arith.divf %39, %40 : vector<8x128xf32>
    %42 = math.tanh %36 : vector<8x128xf32>
    %43 = vector.extract_strided_slice %41 {offsets = [0, 0], sizes = [8, 32], strides = [1, 1]} : vector<8x128xf32> to vector<8x32xf32>
    %44 = vector.extract_strided_slice %41 {offsets = [0, 32], sizes = [8, 32], strides = [1, 1]} : vector<8x128xf32> to vector<8x32xf32>
    %45 = vector.extract_strided_slice %42 {offsets = [0, 64], sizes = [8, 32], strides = [1, 1]} : vector<8x128xf32> to vector<8x32xf32>
    %46 = vector.extract_strided_slice %41 {offsets = [0, 96], sizes = [8, 32], strides = [1, 1]} : vector<8x128xf32> to vector<8x32xf32>
    %47 = arith.mulf %44, %26 : vector<8x32xf32>
    %48 = arith.mulf %43, %45 : vector<8x32xf32>
    %49 = arith.addf %47, %48 : vector<8x32xf32>
    %50 = math.tanh %49 : vector<8x32xf32>
    %51 = arith.mulf %46, %50 : vector<8x32xf32>
    %52 = vector.extract_strided_slice %2 {offsets = [0, 2], sizes = [8, 1], strides = [1, 1]} : vector<8x8xi32> to vector<8x1xi32>
    %53 = vector.broadcast %52 : vector<8x1xi32> to vector<8x56xi32>
    %54 = arith.cmpi eq, %53, %3 : vector<8x56xi32>
    %55 = arith.extui %54 : vector<8x56xi1> to vector<8x56xi32>
    %56 = arith.sitofp %55 : vector<8x56xi32> to vector<8x56xf32>
    %cst_12 = arith.constant dense<0.000000e+00> : vector<8x128xf32>
    %57 = tpu.matmul %56, %0, %cst_12 {dimension_numbers = #tpu.dot_dimension_numbers<[1], [0], [0], [1], [0, 0, 1, 1], [], []>} : vector<8x56xf32>, vector<56x128xf32>, vector<8x128xf32> -> vector<8x128xf32>
    %cst_13 = arith.constant dense<0.000000e+00> : vector<8x128xf32>
    %58 = tpu.matmul %51, %1, %cst_13 {dimension_numbers = #tpu.dot_dimension_numbers<[1], [0], [0], [1], [0, 0, 1, 1], [], []>} : vector<8x32xf32>, vector<32x128xf32>, vector<8x128xf32> -> vector<8x128xf32>
    %59 = arith.addf %57, %58 : vector<8x128xf32>
    %60 = arith.negf %59 : vector<8x128xf32>
    %61 = math.exp %60 : vector<8x128xf32>
    %cst_14 = arith.constant 1.000000e+00 : f32
    %62 = vector.broadcast %cst_14 : f32 to vector<8x128xf32>
    %63 = arith.addf %62, %61 : vector<8x128xf32>
    %64 = arith.divf %62, %63 : vector<8x128xf32>
    %65 = math.tanh %59 : vector<8x128xf32>
    %66 = vector.extract_strided_slice %64 {offsets = [0, 0], sizes = [8, 32], strides = [1, 1]} : vector<8x128xf32> to vector<8x32xf32>
    %67 = vector.extract_strided_slice %64 {offsets = [0, 32], sizes = [8, 32], strides = [1, 1]} : vector<8x128xf32> to vector<8x32xf32>
    %68 = vector.extract_strided_slice %65 {offsets = [0, 64], sizes = [8, 32], strides = [1, 1]} : vector<8x128xf32> to vector<8x32xf32>
    %69 = vector.extract_strided_slice %64 {offsets = [0, 96], sizes = [8, 32], strides = [1, 1]} : vector<8x128xf32> to vector<8x32xf32>
    %70 = arith.mulf %67, %49 : vector<8x32xf32>
    %71 = arith.mulf %66, %68 : vector<8x32xf32>
    %72 = arith.addf %70, %71 : vector<8x32xf32>
    %73 = math.tanh %72 : vector<8x32xf32>
    %74 = arith.mulf %69, %73 : vector<8x32xf32>
    %75 = vector.extract_strided_slice %2 {offsets = [0, 3], sizes = [8, 1], strides = [1, 1]} : vector<8x8xi32> to vector<8x1xi32>
    %76 = vector.broadcast %75 : vector<8x1xi32> to vector<8x56xi32>
    %77 = arith.cmpi eq, %76, %3 : vector<8x56xi32>
    %78 = arith.extui %77 : vector<8x56xi1> to vector<8x56xi32>
    %79 = arith.sitofp %78 : vector<8x56xi32> to vector<8x56xf32>
    %cst_15 = arith.constant dense<0.000000e+00> : vector<8x128xf32>
    %80 = tpu.matmul %79, %0, %cst_15 {dimension_numbers = #tpu.dot_dimension_numbers<[1], [0], [0], [1], [0, 0, 1, 1], [], []>} : vector<8x56xf32>, vector<56x128xf32>, vector<8x128xf32> -> vector<8x128xf32>
    %cst_16 = arith.constant dense<0.000000e+00> : vector<8x128xf32>
    %81 = tpu.matmul %74, %1, %cst_16 {dimension_numbers = #tpu.dot_dimension_numbers<[1], [0], [0], [1], [0, 0, 1, 1], [], []>} : vector<8x32xf32>, vector<32x128xf32>, vector<8x128xf32> -> vector<8x128xf32>
    %82 = arith.addf %80, %81 : vector<8x128xf32>
    %83 = arith.negf %82 : vector<8x128xf32>
    %84 = math.exp %83 : vector<8x128xf32>
    %cst_17 = arith.constant 1.000000e+00 : f32
    %85 = vector.broadcast %cst_17 : f32 to vector<8x128xf32>
    %86 = arith.addf %85, %84 : vector<8x128xf32>
    %87 = arith.divf %85, %86 : vector<8x128xf32>
    %88 = math.tanh %82 : vector<8x128xf32>
    %89 = vector.extract_strided_slice %87 {offsets = [0, 0], sizes = [8, 32], strides = [1, 1]} : vector<8x128xf32> to vector<8x32xf32>
    %90 = vector.extract_strided_slice %87 {offsets = [0, 32], sizes = [8, 32], strides = [1, 1]} : vector<8x128xf32> to vector<8x32xf32>
    %91 = vector.extract_strided_slice %88 {offsets = [0, 64], sizes = [8, 32], strides = [1, 1]} : vector<8x128xf32> to vector<8x32xf32>
    %92 = vector.extract_strided_slice %87 {offsets = [0, 96], sizes = [8, 32], strides = [1, 1]} : vector<8x128xf32> to vector<8x32xf32>
    %93 = arith.mulf %90, %72 : vector<8x32xf32>
    %94 = arith.mulf %89, %91 : vector<8x32xf32>
    %95 = arith.addf %93, %94 : vector<8x32xf32>
    %96 = math.tanh %95 : vector<8x32xf32>
    %97 = arith.mulf %92, %96 : vector<8x32xf32>
    %98 = vector.extract_strided_slice %2 {offsets = [0, 4], sizes = [8, 1], strides = [1, 1]} : vector<8x8xi32> to vector<8x1xi32>
    %99 = vector.broadcast %98 : vector<8x1xi32> to vector<8x56xi32>
    %100 = arith.cmpi eq, %99, %3 : vector<8x56xi32>
    %101 = arith.extui %100 : vector<8x56xi1> to vector<8x56xi32>
    %102 = arith.sitofp %101 : vector<8x56xi32> to vector<8x56xf32>
    %cst_18 = arith.constant dense<0.000000e+00> : vector<8x128xf32>
    %103 = tpu.matmul %102, %0, %cst_18 {dimension_numbers = #tpu.dot_dimension_numbers<[1], [0], [0], [1], [0, 0, 1, 1], [], []>} : vector<8x56xf32>, vector<56x128xf32>, vector<8x128xf32> -> vector<8x128xf32>
    %cst_19 = arith.constant dense<0.000000e+00> : vector<8x128xf32>
    %104 = tpu.matmul %97, %1, %cst_19 {dimension_numbers = #tpu.dot_dimension_numbers<[1], [0], [0], [1], [0, 0, 1, 1], [], []>} : vector<8x32xf32>, vector<32x128xf32>, vector<8x128xf32> -> vector<8x128xf32>
    %105 = arith.addf %103, %104 : vector<8x128xf32>
    %106 = arith.negf %105 : vector<8x128xf32>
    %107 = math.exp %106 : vector<8x128xf32>
    %cst_20 = arith.constant 1.000000e+00 : f32
    %108 = vector.broadcast %cst_20 : f32 to vector<8x128xf32>
    %109 = arith.addf %108, %107 : vector<8x128xf32>
    %110 = arith.divf %108, %109 : vector<8x128xf32>
    %111 = math.tanh %105 : vector<8x128xf32>
    %112 = vector.extract_strided_slice %110 {offsets = [0, 0], sizes = [8, 32], strides = [1, 1]} : vector<8x128xf32> to vector<8x32xf32>
    %113 = vector.extract_strided_slice %110 {offsets = [0, 32], sizes = [8, 32], strides = [1, 1]} : vector<8x128xf32> to vector<8x32xf32>
    %114 = vector.extract_strided_slice %111 {offsets = [0, 64], sizes = [8, 32], strides = [1, 1]} : vector<8x128xf32> to vector<8x32xf32>
    %115 = vector.extract_strided_slice %110 {offsets = [0, 96], sizes = [8, 32], strides = [1, 1]} : vector<8x128xf32> to vector<8x32xf32>
    %116 = arith.mulf %113, %95 : vector<8x32xf32>
    %117 = arith.mulf %112, %114 : vector<8x32xf32>
    %118 = arith.addf %116, %117 : vector<8x32xf32>
    %119 = math.tanh %118 : vector<8x32xf32>
    %120 = arith.mulf %115, %119 : vector<8x32xf32>
    %121 = vector.extract_strided_slice %2 {offsets = [0, 5], sizes = [8, 1], strides = [1, 1]} : vector<8x8xi32> to vector<8x1xi32>
    %122 = vector.broadcast %121 : vector<8x1xi32> to vector<8x56xi32>
    %123 = arith.cmpi eq, %122, %3 : vector<8x56xi32>
    %124 = arith.extui %123 : vector<8x56xi1> to vector<8x56xi32>
    %125 = arith.sitofp %124 : vector<8x56xi32> to vector<8x56xf32>
    %cst_21 = arith.constant dense<0.000000e+00> : vector<8x128xf32>
    %126 = tpu.matmul %125, %0, %cst_21 {dimension_numbers = #tpu.dot_dimension_numbers<[1], [0], [0], [1], [0, 0, 1, 1], [], []>} : vector<8x56xf32>, vector<56x128xf32>, vector<8x128xf32> -> vector<8x128xf32>
    %cst_22 = arith.constant dense<0.000000e+00> : vector<8x128xf32>
    %127 = tpu.matmul %120, %1, %cst_22 {dimension_numbers = #tpu.dot_dimension_numbers<[1], [0], [0], [1], [0, 0, 1, 1], [], []>} : vector<8x32xf32>, vector<32x128xf32>, vector<8x128xf32> -> vector<8x128xf32>
    %128 = arith.addf %126, %127 : vector<8x128xf32>
    %129 = arith.negf %128 : vector<8x128xf32>
    %130 = math.exp %129 : vector<8x128xf32>
    %cst_23 = arith.constant 1.000000e+00 : f32
    %131 = vector.broadcast %cst_23 : f32 to vector<8x128xf32>
    %132 = arith.addf %131, %130 : vector<8x128xf32>
    %133 = arith.divf %131, %132 : vector<8x128xf32>
    %134 = math.tanh %128 : vector<8x128xf32>
    %135 = vector.extract_strided_slice %133 {offsets = [0, 0], sizes = [8, 32], strides = [1, 1]} : vector<8x128xf32> to vector<8x32xf32>
    %136 = vector.extract_strided_slice %133 {offsets = [0, 32], sizes = [8, 32], strides = [1, 1]} : vector<8x128xf32> to vector<8x32xf32>
    %137 = vector.extract_strided_slice %134 {offsets = [0, 64], sizes = [8, 32], strides = [1, 1]} : vector<8x128xf32> to vector<8x32xf32>
    %138 = vector.extract_strided_slice %133 {offsets = [0, 96], sizes = [8, 32], strides = [1, 1]} : vector<8x128xf32> to vector<8x32xf32>
    %139 = arith.mulf %136, %118 : vector<8x32xf32>
    %140 = arith.mulf %135, %137 : vector<8x32xf32>
    %141 = arith.addf %139, %140 : vector<8x32xf32>
    %142 = math.tanh %141 : vector<8x32xf32>
    %143 = arith.mulf %138, %142 : vector<8x32xf32>
    %144 = vector.extract_strided_slice %2 {offsets = [0, 6], sizes = [8, 1], strides = [1, 1]} : vector<8x8xi32> to vector<8x1xi32>
    %145 = vector.broadcast %144 : vector<8x1xi32> to vector<8x56xi32>
    %146 = arith.cmpi eq, %145, %3 : vector<8x56xi32>
    %147 = arith.extui %146 : vector<8x56xi1> to vector<8x56xi32>
    %148 = arith.sitofp %147 : vector<8x56xi32> to vector<8x56xf32>
    %cst_24 = arith.constant dense<0.000000e+00> : vector<8x128xf32>
    %149 = tpu.matmul %148, %0, %cst_24 {dimension_numbers = #tpu.dot_dimension_numbers<[1], [0], [0], [1], [0, 0, 1, 1], [], []>} : vector<8x56xf32>, vector<56x128xf32>, vector<8x128xf32> -> vector<8x128xf32>
    %cst_25 = arith.constant dense<0.000000e+00> : vector<8x128xf32>
    %150 = tpu.matmul %143, %1, %cst_25 {dimension_numbers = #tpu.dot_dimension_numbers<[1], [0], [0], [1], [0, 0, 1, 1], [], []>} : vector<8x32xf32>, vector<32x128xf32>, vector<8x128xf32> -> vector<8x128xf32>
    %151 = arith.addf %149, %150 : vector<8x128xf32>
    %152 = arith.negf %151 : vector<8x128xf32>
    %153 = math.exp %152 : vector<8x128xf32>
    %cst_26 = arith.constant 1.000000e+00 : f32
    %154 = vector.broadcast %cst_26 : f32 to vector<8x128xf32>
    %155 = arith.addf %154, %153 : vector<8x128xf32>
    %156 = arith.divf %154, %155 : vector<8x128xf32>
    %157 = math.tanh %151 : vector<8x128xf32>
    %158 = vector.extract_strided_slice %156 {offsets = [0, 0], sizes = [8, 32], strides = [1, 1]} : vector<8x128xf32> to vector<8x32xf32>
    %159 = vector.extract_strided_slice %156 {offsets = [0, 32], sizes = [8, 32], strides = [1, 1]} : vector<8x128xf32> to vector<8x32xf32>
    %160 = vector.extract_strided_slice %157 {offsets = [0, 64], sizes = [8, 32], strides = [1, 1]} : vector<8x128xf32> to vector<8x32xf32>
    %161 = vector.extract_strided_slice %156 {offsets = [0, 96], sizes = [8, 32], strides = [1, 1]} : vector<8x128xf32> to vector<8x32xf32>
    %162 = arith.mulf %159, %141 : vector<8x32xf32>
    %163 = arith.mulf %158, %160 : vector<8x32xf32>
    %164 = arith.addf %162, %163 : vector<8x32xf32>
    %165 = math.tanh %164 : vector<8x32xf32>
    %166 = arith.mulf %161, %165 : vector<8x32xf32>
    %167 = vector.extract_strided_slice %2 {offsets = [0, 7], sizes = [8, 1], strides = [1, 1]} : vector<8x8xi32> to vector<8x1xi32>
    %168 = vector.broadcast %167 : vector<8x1xi32> to vector<8x56xi32>
    %169 = arith.cmpi eq, %168, %3 : vector<8x56xi32>
    %170 = arith.extui %169 : vector<8x56xi1> to vector<8x56xi32>
    %171 = arith.sitofp %170 : vector<8x56xi32> to vector<8x56xf32>
    %cst_27 = arith.constant dense<0.000000e+00> : vector<8x128xf32>
    %172 = tpu.matmul %171, %0, %cst_27 {dimension_numbers = #tpu.dot_dimension_numbers<[1], [0], [0], [1], [0, 0, 1, 1], [], []>} : vector<8x56xf32>, vector<56x128xf32>, vector<8x128xf32> -> vector<8x128xf32>
    %cst_28 = arith.constant dense<0.000000e+00> : vector<8x128xf32>
    %173 = tpu.matmul %166, %1, %cst_28 {dimension_numbers = #tpu.dot_dimension_numbers<[1], [0], [0], [1], [0, 0, 1, 1], [], []>} : vector<8x32xf32>, vector<32x128xf32>, vector<8x128xf32> -> vector<8x128xf32>
    %174 = arith.addf %172, %173 : vector<8x128xf32>
    %175 = arith.negf %174 : vector<8x128xf32>
    %176 = math.exp %175 : vector<8x128xf32>
    %cst_29 = arith.constant 1.000000e+00 : f32
    %177 = vector.broadcast %cst_29 : f32 to vector<8x128xf32>
    %178 = arith.addf %177, %176 : vector<8x128xf32>
    %179 = arith.divf %177, %178 : vector<8x128xf32>
    %180 = math.tanh %174 : vector<8x128xf32>
    %181 = vector.extract_strided_slice %179 {offsets = [0, 0], sizes = [8, 32], strides = [1, 1]} : vector<8x128xf32> to vector<8x32xf32>
    %182 = vector.extract_strided_slice %179 {offsets = [0, 32], sizes = [8, 32], strides = [1, 1]} : vector<8x128xf32> to vector<8x32xf32>
    %183 = vector.extract_strided_slice %180 {offsets = [0, 64], sizes = [8, 32], strides = [1, 1]} : vector<8x128xf32> to vector<8x32xf32>
    %184 = vector.extract_strided_slice %179 {offsets = [0, 96], sizes = [8, 32], strides = [1, 1]} : vector<8x128xf32> to vector<8x32xf32>
    %185 = arith.mulf %182, %164 : vector<8x32xf32>
    %186 = arith.mulf %181, %183 : vector<8x32xf32>
    %187 = arith.addf %185, %186 : vector<8x32xf32>
    %188 = math.tanh %187 : vector<8x32xf32>
    %189 = arith.mulf %184, %188 : vector<8x32xf32>
    %c0_30 = arith.constant 0 : index
    %c0_31 = arith.constant 0 : index
    %190 = vector.load %arg4[%c0_30, %c0_31] : memref<1x32xf32, #tpu.memory_space<vmem>>, vector<1x32xf32>
    %191 = math.tanh %28 : vector<8x32xf32>
    %192 = vector.broadcast %190 : vector<1x32xf32> to vector<8x32xf32>
    %193 = arith.mulf %191, %192 : vector<8x32xf32>
    %cst_32 = arith.constant dense<0.000000e+00> : vector<8xf32>
    %194 = vector.multi_reduction <add>, %193, %cst_32 [1] : vector<8x32xf32> to vector<8xf32>
    %195 = vector.shape_cast %194 : vector<8xf32> to vector<8x1xf32>
    %196 = math.tanh %51 : vector<8x32xf32>
    %197 = vector.broadcast %190 : vector<1x32xf32> to vector<8x32xf32>
    %198 = arith.mulf %196, %197 : vector<8x32xf32>
    %cst_33 = arith.constant dense<0.000000e+00> : vector<8xf32>
    %199 = vector.multi_reduction <add>, %198, %cst_33 [1] : vector<8x32xf32> to vector<8xf32>
    %200 = vector.shape_cast %199 : vector<8xf32> to vector<8x1xf32>
    %201 = math.tanh %74 : vector<8x32xf32>
    %202 = vector.broadcast %190 : vector<1x32xf32> to vector<8x32xf32>
    %203 = arith.mulf %201, %202 : vector<8x32xf32>
    %cst_34 = arith.constant dense<0.000000e+00> : vector<8xf32>
    %204 = vector.multi_reduction <add>, %203, %cst_34 [1] : vector<8x32xf32> to vector<8xf32>
    %205 = vector.shape_cast %204 : vector<8xf32> to vector<8x1xf32>
    %206 = math.tanh %97 : vector<8x32xf32>
    %207 = vector.broadcast %190 : vector<1x32xf32> to vector<8x32xf32>
    %208 = arith.mulf %206, %207 : vector<8x32xf32>
    %cst_35 = arith.constant dense<0.000000e+00> : vector<8xf32>
    %209 = vector.multi_reduction <add>, %208, %cst_35 [1] : vector<8x32xf32> to vector<8xf32>
    %210 = vector.shape_cast %209 : vector<8xf32> to vector<8x1xf32>
    %211 = math.tanh %120 : vector<8x32xf32>
    %212 = vector.broadcast %190 : vector<1x32xf32> to vector<8x32xf32>
    %213 = arith.mulf %211, %212 : vector<8x32xf32>
    %cst_36 = arith.constant dense<0.000000e+00> : vector<8xf32>
    %214 = vector.multi_reduction <add>, %213, %cst_36 [1] : vector<8x32xf32> to vector<8xf32>
    %215 = vector.shape_cast %214 : vector<8xf32> to vector<8x1xf32>
    %216 = math.tanh %143 : vector<8x32xf32>
    %217 = vector.broadcast %190 : vector<1x32xf32> to vector<8x32xf32>
    %218 = arith.mulf %216, %217 : vector<8x32xf32>
    %cst_37 = arith.constant dense<0.000000e+00> : vector<8xf32>
    %219 = vector.multi_reduction <add>, %218, %cst_37 [1] : vector<8x32xf32> to vector<8xf32>
    %220 = vector.shape_cast %219 : vector<8xf32> to vector<8x1xf32>
    %221 = math.tanh %166 : vector<8x32xf32>
    %222 = vector.broadcast %190 : vector<1x32xf32> to vector<8x32xf32>
    %223 = arith.mulf %221, %222 : vector<8x32xf32>
    %cst_38 = arith.constant dense<0.000000e+00> : vector<8xf32>
    %224 = vector.multi_reduction <add>, %223, %cst_38 [1] : vector<8x32xf32> to vector<8xf32>
    %225 = vector.shape_cast %224 : vector<8xf32> to vector<8x1xf32>
    %226 = math.tanh %189 : vector<8x32xf32>
    %227 = vector.broadcast %190 : vector<1x32xf32> to vector<8x32xf32>
    %228 = arith.mulf %226, %227 : vector<8x32xf32>
    %cst_39 = arith.constant dense<0.000000e+00> : vector<8xf32>
    %229 = vector.multi_reduction <add>, %228, %cst_39 [1] : vector<8x32xf32> to vector<8xf32>
    %230 = vector.shape_cast %229 : vector<8xf32> to vector<8x1xf32>
    %231 = arith.maximumf %195, %200 : vector<8x1xf32>
    %232 = arith.maximumf %205, %210 : vector<8x1xf32>
    %233 = arith.maximumf %215, %220 : vector<8x1xf32>
    %234 = arith.maximumf %225, %230 : vector<8x1xf32>
    %235 = arith.maximumf %231, %232 : vector<8x1xf32>
    %236 = arith.maximumf %233, %234 : vector<8x1xf32>
    %237 = arith.maximumf %235, %236 : vector<8x1xf32>
    %238 = arith.subf %195, %237 : vector<8x1xf32>
    %239 = math.exp %238 : vector<8x1xf32>
    %240 = arith.subf %200, %237 : vector<8x1xf32>
    %241 = math.exp %240 : vector<8x1xf32>
    %242 = arith.subf %205, %237 : vector<8x1xf32>
    %243 = math.exp %242 : vector<8x1xf32>
    %244 = arith.subf %210, %237 : vector<8x1xf32>
    %245 = math.exp %244 : vector<8x1xf32>
    %246 = arith.subf %215, %237 : vector<8x1xf32>
    %247 = math.exp %246 : vector<8x1xf32>
    %248 = arith.subf %220, %237 : vector<8x1xf32>
    %249 = math.exp %248 : vector<8x1xf32>
    %250 = arith.subf %225, %237 : vector<8x1xf32>
    %251 = math.exp %250 : vector<8x1xf32>
    %252 = arith.subf %230, %237 : vector<8x1xf32>
    %253 = math.exp %252 : vector<8x1xf32>
    %254 = arith.addf %239, %241 : vector<8x1xf32>
    %255 = arith.addf %243, %245 : vector<8x1xf32>
    %256 = arith.addf %247, %249 : vector<8x1xf32>
    %257 = arith.addf %251, %253 : vector<8x1xf32>
    %258 = arith.addf %254, %255 : vector<8x1xf32>
    %259 = arith.addf %256, %257 : vector<8x1xf32>
    %260 = arith.addf %258, %259 : vector<8x1xf32>
    %261 = tpu.reciprocal %260 {approx = true} : vector<8x1xf32> -> vector<8x1xf32>
    %262 = vector.broadcast %239 : vector<8x1xf32> to vector<8x32xf32>
    %263 = arith.mulf %28, %262 : vector<8x32xf32>
    %264 = vector.broadcast %241 : vector<8x1xf32> to vector<8x32xf32>
    %265 = arith.mulf %51, %264 : vector<8x32xf32>
    %266 = vector.broadcast %243 : vector<8x1xf32> to vector<8x32xf32>
    %267 = arith.mulf %74, %266 : vector<8x32xf32>
    %268 = vector.broadcast %245 : vector<8x1xf32> to vector<8x32xf32>
    %269 = arith.mulf %97, %268 : vector<8x32xf32>
    %270 = vector.broadcast %247 : vector<8x1xf32> to vector<8x32xf32>
    %271 = arith.mulf %120, %270 : vector<8x32xf32>
    %272 = vector.broadcast %249 : vector<8x1xf32> to vector<8x32xf32>
    %273 = arith.mulf %143, %272 : vector<8x32xf32>
    %274 = vector.broadcast %251 : vector<8x1xf32> to vector<8x32xf32>
    %275 = arith.mulf %166, %274 : vector<8x32xf32>
    %276 = vector.broadcast %253 : vector<8x1xf32> to vector<8x32xf32>
    %277 = arith.mulf %189, %276 : vector<8x32xf32>
    %278 = arith.addf %263, %265 : vector<8x32xf32>
    %279 = arith.addf %267, %269 : vector<8x32xf32>
    %280 = arith.addf %271, %273 : vector<8x32xf32>
    %281 = arith.addf %275, %277 : vector<8x32xf32>
    %282 = arith.addf %278, %279 : vector<8x32xf32>
    %283 = arith.addf %280, %281 : vector<8x32xf32>
    %284 = arith.addf %282, %283 : vector<8x32xf32>
    %285 = vector.broadcast %261 : vector<8x1xf32> to vector<8x32xf32>
    %286 = arith.mulf %284, %285 : vector<8x32xf32>
    %287 = math.tanh %286 : vector<8x32xf32>
    %c0_40 = arith.constant 0 : index
    %c0_41 = arith.constant 0 : index
    %288 = vector.load %arg5[%c0_40, %c0_41] : memref<32x128xf32, #tpu.memory_space<vmem>>, vector<32x128xf32>
    %cst_42 = arith.constant dense<0.000000e+00> : vector<8x128xf32>
    %289 = tpu.matmul %287, %288, %cst_42 {dimension_numbers = #tpu.dot_dimension_numbers<[1], [0], [0], [1], [0, 0, 1, 1], [], []>} : vector<8x32xf32>, vector<32x128xf32>, vector<8x128xf32> -> vector<8x128xf32>
    %c0_43 = arith.constant 0 : index
    %c0_44 = arith.constant 0 : index
    %290 = vector.load %arg6[%c0_43, %c0_44] : memref<1x128xf32, #tpu.memory_space<vmem>>, vector<1x128xf32>
    %291 = vector.broadcast %290 : vector<1x128xf32> to vector<8x128xf32>
    %292 = arith.addf %289, %291 : vector<8x128xf32>
    %c0_45 = arith.constant 0 : index
    %c0_46 = arith.constant 0 : index
    %293 = vector.load %arg7[%c0_45, %c0_46] : memref<8x128xf32, #tpu.memory_space<vmem>>, vector<8x128xf32>
    tpu.vector_store %arg7[%c0_45, %c0_46], %292 {strides = array<i32>} : memref<8x128xf32, #tpu.memory_space<vmem>>, vector<8x128xf32>,
    return
  }
  func.func @transform_0(%arg0: i32) -> (i32, i32) {
    %c0_i32 = arith.constant 0 : i32
    %c0_i32_0 = arith.constant 0 : i32
    return %arg0, %c0_i32 : i32, i32
  }
  func.func @transform_1(%arg0: i32) -> (i32, i32) {
    %c0_i32 = arith.constant 0 : i32
    %c0_i32_0 = arith.constant 0 : i32
    %c0_i32_1 = arith.constant 0 : i32
    return %c0_i32, %c0_i32_0 : i32, i32
  }
  func.func @transform_2(%arg0: i32) -> (i32, i32) {
    %c0_i32 = arith.constant 0 : i32
    %c0_i32_0 = arith.constant 0 : i32
    %c0_i32_1 = arith.constant 0 : i32
    return %c0_i32, %c0_i32_0 : i32, i32
  }
  func.func @transform_3(%arg0: i32) -> (i32, i32) {
    %c0_i32 = arith.constant 0 : i32
    %c0_i32_0 = arith.constant 0 : i32
    %c0_i32_1 = arith.constant 0 : i32
    return %c0_i32, %c0_i32_0 : i32, i32
  }
  func.func @transform_4(%arg0: i32) -> (i32, i32) {
    %c0_i32 = arith.constant 0 : i32
    %c0_i32_0 = arith.constant 0 : i32
    %c0_i32_1 = arith.constant 0 : i32
    return %c0_i32, %c0_i32_0 : i32, i32
  }
  func.func @transform_5(%arg0: i32) -> (i32, i32) {
    %c0_i32 = arith.constant 0 : i32
    %c0_i32_0 = arith.constant 0 : i32
    %c0_i32_1 = arith.constant 0 : i32
    return %c0_i32, %c0_i32_0 : i32, i32
  }
  func.func @transform_6(%arg0: i32) -> (i32, i32) {
    %c0_i32 = arith.constant 0 : i32
    %c0_i32_0 = arith.constant 0 : i32
    return %arg0, %c0_i32 : i32, i32
  }
}

</mosaic_0001>

<bundles_post_ra>
// kernel: tpu_custom_call.1
= control target key start
LH: loop header
LB: loop body
LE: loop exit
PB: predicated region body
PF: predicated region fallthrough
CT: control target
= control target key end

     0   :  { %11 = vsyncpa [#allocation3], 0  ;;  %s2930_s0 = inlined_call_operand.hbm [shape: s32[8,8], index: 0, kind: input, shape index: {}]   ;;  %s2931_s1 = inlined_call_operand.hbm [shape: f32[56,128], index: 1, kind: input, shape index: {}]   ;;  %s2932_s2 = inlined_call_operand.hbm [shape: f32[32,128], index: 2, kind: input, shape index: {}]   ;;  %s2933_s3 = inlined_call_operand.vmem [shape: f32[1,32], index: 3, kind: input, shape index: {}]   ;;  %s2934_s4 = inlined_call_operand.hbm [shape: f32[32,128], index: 4, kind: input, shape index: {}]   ;;  %s2935_s5 = inlined_call_operand.vmem [shape: f32[1,128], index: 5, kind: input, shape index: {}]   ;;  %s2936_s6 = inlined_call_operand.hbm [shape: f32[8,128], index: 6, kind: output, shape index: {}]  }
   0x1   :  { %12 = vsyncpa [#allocation6], 0 }
   0x2   :  { %13 = vsyncpa [#allocation9], 0 }
   0x3   :  { %14 = vsyncpa [#allocation4], 0  ;;  %s2523_s21 = smov [#allocation5]   ;;  %s2405_s25 = scalar_lea.hbm %s2931_s1, 896 }
   0x4   :  { %s30_s22 = sshll.u32 %s2523_s21, 4  ;;  %p2406_p0 = scmp.ne.s32.totalorder %s2931_s1, %s2405_s25  ;;  %s31_s22 = int_to_ptr.vmem [resolvable:$true] %s30_s22 }
   0x5   :  { %p2409_p1 = scmp.lt.u32.totalorder %s2405_s25, %s2931_s1 }
   0x7   :  { %p2411_p2 = pnand %p2409_p1, %p2406_p0 }
   0x9   :  { %2414 = shalt.err (!%p2411_p2)
}
   0xa   :  { %s2415_s30 = scalar_lea.vmem %s31_s22, 896  ;;  %p2420_p4 = scmp.lt.s32.totalorder %s31_s22, %s31_s22 }
   0xb   :  { %p2416_p3 = scmp.ne.s32.totalorder %s31_s22, %s2415_s30  ;;  %p2421_p5 = scmp.lt.s32.totalorder %s2415_s30, %s2415_s30 }
   0xd   :  { %p2422_p6 = por %p2421_p5, %p2420_p4 }
   0xf   :  { %p2423_p7 = pnand %p2422_p6, %p2416_p3 }
  0x11   :  { %2426 = shalt.err (!%p2423_p7)
}
  0x12   :  { %s2524_s7 = smov 128   ;;  %s2525_s8 = smov 8  }
  0x13   :  { %36 = dma.hbm_to_vmem [thread:$0]  %s2931_s1, 896, %s31_s22, [#allocation6], %s2524_s7, %s2524_s7, %s2525_s8  }
  0x14   :  { %s2526_s11 = smov [#allocation2]   ;;  %s2527_s13 = smov [#allocation7]  }
  0x15   :  { %s21_s12 = sshll.u32 %s2526_s11, 4  ;;  %s42_s14 = sshll.u32 %s2527_s13, 4  ;;  %s22_s12 = int_to_ptr.vmem [resolvable:$true] %s21_s12  ;;  %s43_s14 = int_to_ptr.vmem [resolvable:$true] %s42_s14 }
  0x16   :  { %s2427_s17 = scalar_lea.hbm %s2930_s0, 128 }
  0x17   :  { %p2428_p8 = scmp.ne.s32.totalorder %s2930_s0, %s2427_s17  ;;  %p2431_p9 = scmp.lt.u32.totalorder %s2427_s17, %s2930_s0 }
  0x19   :  { %p2433_p10 = pnand %p2431_p9, %p2428_p8 }
  0x1b   :  { %2436 = shalt.err (!%p2433_p10)
}
  0x1c   :  { %s2437_s1 = scalar_lea.vmem %s22_s12, 128  ;;  %p2442_p12 = scmp.lt.s32.totalorder %s22_s12, %s22_s12 }
  0x1d   :  { %p2438_p11 = scmp.ne.s32.totalorder %s22_s12, %s2437_s1  ;;  %p2443_p13 = scmp.lt.s32.totalorder %s2437_s1, %s2437_s1 }
  0x1f   :  { %p2444_p0 = por %p2443_p13, %p2442_p12 }
  0x21   :  { %p2445_p1 = pnand %p2444_p0, %p2438_p11 }
  0x23   :  { %2448 = shalt.err (!%p2445_p1)
}
  0x24   :  { %24 = dma.hbm_to_vmem [thread:$0]  %s2930_s0, 128, %s22_s12, [#allocation3]  }
  0x25   :  { %s2449_s26 = scalar_lea.hbm %s2932_s2, 512 }
  0x26   :  { %p2450_p2 = scmp.ne.s32.totalorder %s2932_s2, %s2449_s26  ;;  %p2453_p3 = scmp.lt.u32.totalorder %s2449_s26, %s2932_s2 }
  0x28   :  { %p2455_p4 = pnand %p2453_p3, %p2450_p2 }
  0x2a   :  { %2458 = shalt.err (!%p2455_p4)
}
  0x2b   :  { %s2459_s9 = scalar_lea.vmem %s43_s14, 512  ;;  %p2464_p6 = scmp.lt.s32.totalorder %s43_s14, %s43_s14 }
  0x2c   :  { %p2460_p5 = scmp.ne.s32.totalorder %s43_s14, %s2459_s9  ;;  %p2465_p7 = scmp.lt.s32.totalorder %s2459_s9, %s2459_s9 }
  0x2e   :  { %p2466_p8 = por %p2465_p7, %p2464_p6 }
  0x30   :  { %p2467_p9 = pnand %p2466_p8, %p2460_p5 }
  0x32   :  { %2470 = shalt.err (!%p2467_p9)
}
  0x33   :  { %48 = dma.hbm_to_vmem [thread:$0]  %s2932_s2, 512, %s43_s14, [#allocation6], %s2524_s7, %s2524_s7, %s2525_s8  }
  0x34   :  { %s2528_s11 = smov [#allocation8]   ;;  %s2471_s16 = scalar_lea.hbm %s2934_s4, 512 }
  0x35   :  { %s56_s12 = sshll.u32 %s2528_s11, 4  ;;  %p2472_p10 = scmp.ne.s32.totalorder %s2934_s4, %s2471_s16  ;;  %s57_s12 = int_to_ptr.vmem [resolvable:$true] %s56_s12 }
  0x36   :  { %p2475_p11 = scmp.lt.u32.totalorder %s2471_s16, %s2934_s4 }
  0x38   :  { %p2477_p12 = pnand %p2475_p11, %p2472_p10 }
  0x3a   :  { %2480 = shalt.err (!%p2477_p12)
}
  0x3b   :  { %s2481_s21 = scalar_lea.vmem %s57_s12, 512  ;;  %p2486_p0 = scmp.lt.s32.totalorder %s57_s12, %s57_s12 }
  0x3c   :  { %p2482_p13 = scmp.ne.s32.totalorder %s57_s12, %s2481_s21  ;;  %p2487_p1 = scmp.lt.s32.totalorder %s2481_s21, %s2481_s21 }
  0x3e   :  { %p2488_p2 = por %p2487_p1, %p2486_p0 }
  0x40   :  { %p2489_p3 = pnand %p2488_p2, %p2482_p13 }
  0x42   :  { %2492 = shalt.err (!%p2489_p3)
}
  0x43   :  { %62 = dma.hbm_to_vmem [thread:$0]  %s2934_s4, 512, %s57_s12, [#allocation9], %s2524_s7, %s2524_s7, %s2525_s8  }
  0x44   :  { %2515 = dma.done.wait [#allocation3], 128  }
  0x45   :  { %2516 = vsyncadd [#allocation3], 4294967168 }
  0x46   :  { %2517 = dma.done.wait [#allocation6], 1408  }
  0x47   :  { %2518 = vsyncadd [#allocation6], 4294965888 }
  0x48   :  { %2519 = dma.done.wait [#allocation9], 512  }
  0x49   :  { %2520 = vsyncadd [#allocation9], 4294966784  ;;  %v2529_v0 = vmov 0   ;;  %v2530_v1 = vmov 0.0|0.0   ;;  %vm2531_vm0 = vmmov 0   ;;  %v2532_v2 = vmov 0.0  }
  0x4a   :  { %2297 = vset.pattern.permute.xlu0 %v2529_v0  ;;  %2134 = vmatprep.subr.bf16.mxu0 %v2530_v1  ;;  %v2642_v3 = vld [vmem:[#allocation2] sm:$0xff]  ;;  %v85_v5 = vld [vmem:[#allocation7 + $0x8] sm:$0xff]  ;;  %v86_v7 = vld [vmem:[#allocation7 + $0x10] sm:$0xff]  ;;  %v89_v20 = vlaneseq  ;;  %vm171_vm1 = vcmask 457728   ;;  %s2533_s4 = smov 64   ;;  %s2534_s7 = smov 32  }
  0x4b   :  { %1907 = vmatprep.mubr.msk.f32.mxu0 %vm2531_vm0, %v2532_v2  ;;  %2149 = vmatprep.subr.bf16.mxu1 %v2530_v1  ;;  %v84_v4 = vld [vmem:[#allocation7] sm:$0xff]  ;;  %v87_v8 = vld [vmem:[#allocation7 + $0x18] sm:$0xff]  ;;  %v77_v10 = vld [vmem:[#allocation5] sm:$0xff]  ;;  %v2535_v33 = vmov 1   ;;  %vm97_vm3 = vcmask 261120   ;;  %v2536_v52 = vmov 2  }
  0x4c   :  { %1935 = vmatprep.mubr.msk.f32.mxu1 %vm2531_vm0, %v2532_v2  ;;  %92 = vperm.xlu0 %2297, %v2642_v3   ;;  %v2645_v6 = vpack.c.bf16 %v85_v5, %v84_v4  ;;  %v2648_v9 = vpack.c.bf16 %v87_v8, %v86_v7  ;;  %v78_v11 = vld [vmem:[#allocation5 + $0x8] sm:$0xff]  ;;  %v79_v13 = vld [vmem:[#allocation5 + $0x10] sm:$0xff]  ;;  %v80_v14 = vld [vmem:[#allocation5 + $0x18] sm:$0xff]  ;;  %v2676_v21 = vand.u32 127, %v89_v20  ;;  %s2542_s22 = smov 96   ;;  %s2543_s24 = smov [#allocation10]  }
  0x4d   :  { %v2654_v12 = vpack.c.bf16 %v78_v11, %v77_v10  ;;  %v2661_v15 = vpack.c.bf16 %v80_v14, %v79_v13  ;;  %v81_v16 = vld [vmem:[#allocation5 + $0x20] sm:$0xff]  ;;  %v82_v17 = vld [vmem:[#allocation5 + $0x28] sm:$0xff]  ;;  %v2672_v19 = vld [vmem:[#allocation5 + $0x30] sm:$0xff]  ;;  %2298 = vset.pattern.permute.xlu1 %v2535_v33  ;;  %v2537_v13 = vmov 3   ;;  %s1745_s25 = sshll.u32 %s2543_s24, 4  ;;  %s1746_s25 = int_to_ptr.vmem [resolvable:$true] %s1745_s25 }
  0x4e   :  { %2136 = vmatpush3.bf16.msra.mxu0 %v2645_v6  ;;  %2151 = vmatpush3.bf16.msra.mxu1 %v2645_v6  ;;  %v2667_v18 = vpack.c.bf16 %v82_v17, %v81_v16  ;;  %s2493_s26 = scalar_lea.vmem %s1746_s25, 128  ;;  %p2498_p5 = scmp.lt.s32.totalorder %s1746_s25, %s1746_s25 }
  0x4f   :  { %2137 = vmatprep.subr.bf16.mxu0 %v2530_v1  ;;  %2152 = vmatprep.subr.bf16.mxu1 %v2530_v1  ;;  %p2494_p4 = scmp.ne.s32.totalorder %s1746_s25, %s2493_s26  ;;  %p2499_p6 = scmp.lt.s32.totalorder %s2493_s26, %s2493_s26 }
  0x50   :  { %2299 = vset.pattern.permute.xlu0 %v2536_v52 }
  0x51   :  { %p2500_p7 = por %p2499_p6, %p2498_p5 }
  0x52   :  { %2139 = vmatpush3.bf16.msra.mxu0 %v2648_v9  ;;  %2154 = vmatpush3.bf16.msra.mxu1 %v2648_v9 }
  0x53   :  { %2140 = vmatprep.subr.bf16.mxu0 %v2530_v1  ;;  %2155 = vmatprep.subr.bf16.mxu1 %v2530_v1  ;;  %p2501_p8 = pnand %p2500_p7, %p2494_p4 }
  0x55   :  { %1908 = vmatmul.mubr.f32.vlgmr.msra.gmra.mrb[0].mxu0 %v2532_v2 }
  0x56   :  { %2142 = vmatpush3.bf16.msra.mxu0 %v2654_v12  ;;  %1924 = vmatprep.mubr.msk.f32.mxu0 %vm2531_vm0, %v2532_v2 }
  0x57   :  { %2143 = vmatprep.subr.bf16.mxu0 %v2530_v1 }
  0x5a   :  { %2145 = vmatpush3.bf16.msra.mxu0 %v2661_v15 }
  0x5b   :  { %2146 = vmatprep.subr.bf16.mxu0 %v2530_v1 }
  0x5e   :  { %2148 = vmatpush3.bf16.msra.mxu0 %v2667_v18 }
  0x5f   :  { %1922 = vmatprep.subr.mxu0 %v2532_v2 }
  0x62   :  { %1923 = vmatpush3.msra.mxu0 %v2672_v19 }
  0x63   :  { %2164 = vmatprep.subr.bf16.mxu0 %v2530_v1 }
  0xcb   :  { %v93_v22 = vpop.permute.xlu0 %92 }
  0xcc   :  { %vm94_vm2 = vcmp.eq.s32.totalorder %v93_v22, %v2676_v21 }
  0xcd   :  { %v1756_v23 = vsel %vm94_vm2, 1.0, %v2532_v2 }
  0xce   :  { %1925 = vmatmul.mubr.msk.f32.vlgmr.msra.gmra.mrb[0].mxu0 %vm171_vm1, %v1756_v23 }
  0xcf   :  { %2166 = vmatpush3.bf16.msra.mxu0 %v2645_v6  ;;  %1963 = vmatprep.mubr.msk.f32.mxu0 %vm2531_vm0, %v2532_v2 }
  0xd0   :  { %2167 = vmatprep.subr.bf16.mxu0 %v2530_v1 }
  0xd3   :  { %2169 = vmatpush3.bf16.msra.mxu0 %v2648_v9 }
  0xd4   :  { %2170 = vmatprep.subr.bf16.mxu0 %v2530_v1 }
 0x1a1   :  { %v241_v24 = vpop.f32.mrb[0].mxu0 }
 0x1a2   :  { %2305 = vtanh.f32 %v241_v24  ;;  %v1926_v25 = vpop.f32.mrb[1].mxu0  ;;  %v1758_v27 = vmul.f32 -1.442695, %v241_v24 }
 0x1a4   :  { %2307 = vpow2.f32 %v1758_v27 }
 0x1ac   :  { %v2306_v26 = vpop.eup %2305 }
 0x1ad   :  { %254 = vrot.lane.b32.xlu0 %v2306_v26, %s2533_s4 }
 0x1ae   :  { %v2308_v28 = vpop.eup %2307 }
 0x1af   :  { %v248_v29 = vadd.f32 1.0, %v2308_v28 }
 0x1b1   :  { %2309 = vrcp.f32 %v248_v29 }
 0x1bb   :  { %v2310_v30 = vpop.eup %2309 }
 0x1bc   :  { %v252_v34 = vmul.f32 0.0, %v2310_v30 }
 0x21f   :  { %v255_v31 = vpop.permute.xlu0 %254 }
 0x220   :  { %v257_v32 = vmul.f32 %v2310_v30, %v255_v31 }
 0x222   :  { %259 = vrot.lane.b32.xlu1 %v257_v32, %s2534_s7 }
 0x294   :  { %v260_v35 = vpop.permute.xlu1 %259 }
 0x295   :  { %v262_v36 = vadd.f32 %v260_v35, %v252_v34 }
 0x297   :  { %2311 = vtanh.f32 %v262_v36 }
 0x2a1   :  { %v2312_v37 = vpop.eup %2311 }
 0x2a2   :  { %265 = vrot.lane.b32.xlu1 %v2312_v37, %s2533_s4 }
 0x2a6   :  { %270 = vperm.xlu1 %2298, %v2642_v3  }
 0x314   :  { %v266_v38 = vpop.permute.xlu1 %265 }
 0x315   :  { %v2691_v39 = vmul.f32 %v2310_v30, %v266_v38 }
 0x317   :  { %276 = vrot.lane.b32.xlu0 %v2691_v39, %s2534_s7 }
 0x325   :  { %v271_v41 = vpop.permute.xlu1 %270 }
 0x326   :  { %vm272_vm4 = vcmp.eq.s32.totalorder %v271_v41, %v2676_v21 }
 0x327   :  { %v1759_v42 = vsel %vm272_vm4, 1.0, %v2532_v2 }
 0x389   :  { %v277_v40 = vpop.permute.xlu0 %276 }
 0x38a   :  { %1936 = vmatmul.mubr.msk.f32.vlgmr.msra.gmra.mrb[0].mxu1 %vm97_vm3, %v277_v40 }
 0x38b   :  { %2157 = vmatpush3.bf16.msra.mxu1 %v2654_v12  ;;  %1952 = vmatprep.mubr.msk.f32.mxu1 %vm2531_vm0, %v2532_v2 }
 0x38c   :  { %2158 = vmatprep.subr.bf16.mxu1 %v2530_v1 }
 0x38f   :  { %2160 = vmatpush3.bf16.msra.mxu1 %v2661_v15 }
 0x390   :  { %2161 = vmatprep.subr.bf16.mxu1 %v2530_v1 }
 0x393   :  { %2163 = vmatpush3.bf16.msra.mxu1 %v2667_v18 }
 0x394   :  { %1950 = vmatprep.subr.mxu1 %v2532_v2 }
 0x397   :  { %1951 = vmatpush3.msra.mxu1 %v2672_v19 }
 0x398   :  { %1953 = vmatmul.mubr.msk.f32.vlgmr.msra.gmra.mrb[0].mxu1 %vm171_vm1, %v1759_v42  ;;  %2179 = vmatprep.subr.bf16.mxu1 %v2530_v1 }
 0x399   :  { %2181 = vmatpush3.bf16.msra.mxu1 %v2645_v6  ;;  %1991 = vmatprep.mubr.msk.f32.mxu1 %vm2531_vm0, %v2532_v2 }
 0x39a   :  { %2182 = vmatprep.subr.bf16.mxu1 %v2530_v1 }
 0x39d   :  { %2184 = vmatpush3.bf16.msra.mxu1 %v2648_v9 }
 0x39e   :  { %2185 = vmatprep.subr.bf16.mxu1 %v2530_v1 }
 0x46b   :  { %v419_v43 = vpop.f32.mrb[0].mxu1 }
 0x46c   :  { %2313 = vtanh.f32 %v419_v43  ;;  %v1954_v44 = vpop.f32.mrb[1].mxu1  ;;  %v1762_v46 = vmul.f32 -1.442695, %v419_v43 }
 0x46e   :  { %2315 = vpow2.f32 %v1762_v46 }
 0x476   :  { %v2314_v45 = vpop.eup %2313 }
 0x477   :  { %432 = vrot.lane.b32.xlu0 %v2314_v45, %s2533_s4 }
 0x478   :  { %v2316_v47 = vpop.eup %2315 }
 0x479   :  { %v426_v48 = vadd.f32 1.0, %v2316_v47 }
 0x47b   :  { %2317 = vrcp.f32 %v426_v48 }
 0x485   :  { %v2318_v49 = vpop.eup %2317 }
 0x486   :  { %v430_v53 = vmul.f32 %v2318_v49, %v262_v36  ;;  %v2538_v36 = vmov 4  }
 0x4e9   :  { %v433_v50 = vpop.permute.xlu0 %432 }
 0x4ea   :  { %v435_v51 = vmul.f32 %v2318_v49, %v433_v50 }
 0x4ec   :  { %437 = vrot.lane.b32.xlu1 %v435_v51, %s2534_s7 }
 0x55e   :  { %v438_v54 = vpop.permute.xlu1 %437 }
 0x55f   :  { %v440_v55 = vadd.f32 %v438_v54, %v430_v53 }
 0x561   :  { %2319 = vtanh.f32 %v440_v55 }
 0x56b   :  { %v2320_v56 = vpop.eup %2319 }
 0x56c   :  { %443 = vrot.lane.b32.xlu0 %v2320_v56, %s2533_s4  ;;  %v2539_v56 = vmov 5  }
 0x570   :  { %448 = vperm.xlu0 %2299, %v2642_v3  }
 0x574   :  { %2300 = vset.pattern.permute.xlu0 %v2537_v13 }
 0x5de   :  { %v444_v57 = vpop.permute.xlu0 %443 }
 0x5df   :  { %v2719_v58 = vmul.f32 %v2318_v49, %v444_v57 }
 0x5e1   :  { %454 = vrot.lane.b32.xlu1 %v2719_v58, %s2534_s7 }
 0x5ef   :  { %v449_v60 = vpop.permute.xlu0 %448 }
 0x5f0   :  { %vm450_vm5 = vcmp.eq.s32.totalorder %v449_v60, %v2676_v21 }
 0x5f1   :  { %v1763_v61 = vsel %vm450_vm5, 1.0, %v2532_v2 }
 0x653   :  { %v455_v59 = vpop.permute.xlu1 %454 }
 0x654   :  { %1964 = vmatmul.mubr.msk.f32.vlgmr.msra.gmra.mrb[2].mxu0 %vm97_vm3, %v455_v59 }
 0x655   :  { %2172 = vmatpush3.bf16.msra.mxu0 %v2654_v12  ;;  %1980 = vmatprep.mubr.msk.f32.mxu0 %vm2531_vm0, %v2532_v2 }
 0x656   :  { %2173 = vmatprep.subr.bf16.mxu0 %v2530_v1 }
 0x659   :  { %2175 = vmatpush3.bf16.msra.mxu0 %v2661_v15 }
 0x65a   :  { %2176 = vmatprep.subr.bf16.mxu0 %v2530_v1 }
 0x65d   :  { %2178 = vmatpush3.bf16.msra.mxu0 %v2667_v18 }
 0x65e   :  { %1978 = vmatprep.subr.mxu0 %v2532_v2 }
 0x661   :  { %1979 = vmatpush3.msra.mxu0 %v2672_v19 }
 0x662   :  { %1981 = vmatmul.mubr.msk.f32.vlgmr.msra.gmra.mrb[2].mxu0 %vm171_vm1, %v1763_v61  ;;  %2194 = vmatprep.subr.bf16.mxu0 %v2530_v1 }
 0x663   :  { %2196 = vmatpush3.bf16.msra.mxu0 %v2645_v6  ;;  %2019 = vmatprep.mubr.msk.f32.mxu0 %vm2531_vm0, %v2532_v2 }
 0x664   :  { %2197 = vmatprep.subr.bf16.mxu0 %v2530_v1 }
 0x667   :  { %2199 = vmatpush3.bf16.msra.mxu0 %v2648_v9 }
 0x668   :  { %2200 = vmatprep.subr.bf16.mxu0 %v2530_v1 }
 0x735   :  { %v597_v62 = vpop.f32.mrb[2].mxu0 }
 0x736   :  { %2321 = vtanh.f32 %v597_v62  ;;  %v1982_v63 = vpop.f32.mrb[3].mxu0  ;;  %v1766_v4 = vmul.f32 -1.442695, %v597_v62 }
 0x738   :  { %2323 = vpow2.f32 %v1766_v4 }
 0x740   :  { %v2322_v0 = vpop.eup %2321 }
 0x741   :  { %610 = vrot.lane.b32.xlu1 %v2322_v0, %s2533_s4 }
 0x742   :  { %v2324_v5 = vpop.eup %2323 }
 0x743   :  { %v604_v7 = vadd.f32 1.0, %v2324_v5 }
 0x745   :  { %2325 = vrcp.f32 %v604_v7 }
 0x74f   :  { %v2326_v8 = vpop.eup %2325 }
 0x750   :  { %v608_v14 = vmul.f32 %v2326_v8, %v440_v55 }
 0x7b3   :  { %v611_v10 = vpop.permute.xlu1 %610 }
 0x7b4   :  { %v613_v11 = vmul.f32 %v2326_v8, %v611_v10 }
 0x7b6   :  { %615 = vrot.lane.b32.xlu1 %v613_v11, %s2534_s7 }
 0x828   :  { %v616_v16 = vpop.permute.xlu1 %615 }
 0x829   :  { %v618_v17 = vadd.f32 %v616_v16, %v608_v14 }
 0x82b   :  { %2327 = vtanh.f32 %v618_v17 }
 0x835   :  { %v2328_v20 = vpop.eup %2327 }
 0x836   :  { %621 = vrot.lane.b32.xlu0 %v2328_v20, %s2533_s4  ;;  %v2540_v20 = vmov 6  }
 0x83a   :  { %626 = vperm.xlu0 %2300, %v2642_v3  }
 0x83e   :  { %2301 = vset.pattern.permute.xlu0 %v2538_v36 }
 0x8a8   :  { %v622_v22 = vpop.permute.xlu0 %621 }
 0x8a9   :  { %v2747_v23 = vmul.f32 %v2326_v8, %v622_v22 }
 0x8ab   :  { %632 = vrot.lane.b32.xlu1 %v2747_v23, %s2534_s7 }
 0x8b9   :  { %v627_v25 = vpop.permute.xlu0 %626 }
 0x8ba   :  { %vm628_vm6 = vcmp.eq.s32.totalorder %v627_v25, %v2676_v21 }
 0x8bb   :  { %v1767_v26 = vsel %vm628_vm6, 1.0, %v2532_v2 }
 0x91d   :  { %v633_v24 = vpop.permute.xlu1 %632 }
 0x91e   :  { %1992 = vmatmul.mubr.msk.f32.vlgmr.msra.gmra.mrb[2].mxu1 %vm97_vm3, %v633_v24 }
 0x91f   :  { %2187 = vmatpush3.bf16.msra.mxu1 %v2654_v12  ;;  %2008 = vmatprep.mubr.msk.f32.mxu1 %vm2531_vm0, %v2532_v2 }
 0x920   :  { %2188 = vmatprep.subr.bf16.mxu1 %v2530_v1 }
 0x923   :  { %2190 = vmatpush3.bf16.msra.mxu1 %v2661_v15 }
 0x924   :  { %2191 = vmatprep.subr.bf16.mxu1 %v2530_v1 }
 0x927   :  { %2193 = vmatpush3.bf16.msra.mxu1 %v2667_v18 }
 0x928   :  { %2006 = vmatprep.subr.mxu1 %v2532_v2 }
 0x92b   :  { %2007 = vmatpush3.msra.mxu1 %v2672_v19 }
 0x92c   :  { %2009 = vmatmul.mubr.msk.f32.vlgmr.msra.gmra.mrb[2].mxu1 %vm171_vm1, %v1767_v26  ;;  %2209 = vmatprep.subr.bf16.mxu1 %v2530_v1 }
 0x92d   :  { %2211 = vmatpush3.bf16.msra.mxu1 %v2645_v6  ;;  %2047 = vmatprep.mubr.msk.f32.mxu1 %vm2531_vm0, %v2532_v2 }
 0x92e   :  { %2212 = vmatprep.subr.bf16.mxu1 %v2530_v1 }
 0x931   :  { %2214 = vmatpush3.bf16.msra.mxu1 %v2648_v9 }
 0x932   :  { %2215 = vmatprep.subr.bf16.mxu1 %v2530_v1 }
 0x9ff   :  { %v775_v27 = vpop.f32.mrb[2].mxu1 }
 0xa00   :  { %2329 = vtanh.f32 %v775_v27  ;;  %v2010_v28 = vpop.f32.mrb[3].mxu1  ;;  %v1770_v30 = vmul.f32 -1.442695, %v775_v27 }
 0xa02   :  { %2331 = vpow2.f32 %v1770_v30 }
 0xa0a   :  { %v2330_v29 = vpop.eup %2329 }
 0xa0b   :  { %788 = vrot.lane.b32.xlu1 %v2330_v29, %s2533_s4 }
 0xa0c   :  { %v2332_v31 = vpop.eup %2331 }
 0xa0d   :  { %v782_v32 = vadd.f32 1.0, %v2332_v31 }
 0xa0f   :  { %2333 = vrcp.f32 %v782_v32 }
 0xa19   :  { %v2334_v33 = vpop.eup %2333 }
 0xa1a   :  { %v786_v37 = vmul.f32 %v2334_v33, %v618_v17 }
 0xa7d   :  { %v789_v34 = vpop.permute.xlu1 %788 }
 0xa7e   :  { %v791_v35 = vmul.f32 %v2334_v33, %v789_v34 }
 0xa80   :  { %793 = vrot.lane.b32.xlu1 %v791_v35, %s2534_s7 }
 0xaf2   :  { %v794_v38 = vpop.permute.xlu1 %793 }
 0xaf3   :  { %v796_v40 = vadd.f32 %v794_v38, %v786_v37 }
 0xaf5   :  { %2335 = vtanh.f32 %v796_v40 }
 0xaff   :  { %v2336_v41 = vpop.eup %2335 }
 0xb00   :  { %799 = vrot.lane.b32.xlu0 %v2336_v41, %s2533_s4  ;;  %v2541_v41 = vmov 7  }
 0xb04   :  { %804 = vperm.xlu0 %2301, %v2642_v3  }
 0xb08   :  { %2302 = vset.pattern.permute.xlu0 %v2539_v56 }
 0xb72   :  { %v800_v42 = vpop.permute.xlu0 %799 }
 0xb73   :  { %v2775_v43 = vmul.f32 %v2334_v33, %v800_v42 }
 0xb75   :  { %810 = vrot.lane.b32.xlu1 %v2775_v43, %s2534_s7 }
 0xb83   :  { %v805_v45 = vpop.permute.xlu0 %804 }
 0xb84   :  { %vm806_vm7 = vcmp.eq.s32.totalorder %v805_v45, %v2676_v21 }
 0xb85   :  { %v1771_v46 = vsel %vm806_vm7, 1.0, %v2532_v2 }
 0xbe7   :  { %v811_v44 = vpop.permute.xlu1 %810 }
 0xbe8   :  { %2020 = vmatmul.mubr.msk.f32.vlgmr.msra.gmra.mrb[4].mxu0 %vm97_vm3, %v811_v44 }
 0xbe9   :  { %2202 = vmatpush3.bf16.msra.mxu0 %v2654_v12  ;;  %2036 = vmatprep.mubr.msk.f32.mxu0 %vm2531_vm0, %v2532_v2 }
 0xbea   :  { %2203 = vmatprep.subr.bf16.mxu0 %v2530_v1 }
 0xbed   :  { %2205 = vmatpush3.bf16.msra.mxu0 %v2661_v15 }
 0xbee   :  { %2206 = vmatprep.subr.bf16.mxu0 %v2530_v1 }
 0xbf1   :  { %2208 = vmatpush3.bf16.msra.mxu0 %v2667_v18 }
 0xbf2   :  { %2034 = vmatprep.subr.mxu0 %v2532_v2 }
 0xbf5   :  { %2035 = vmatpush3.msra.mxu0 %v2672_v19 }
 0xbf6   :  { %2037 = vmatmul.mubr.msk.f32.vlgmr.msra.gmra.mrb[4].mxu0 %vm171_vm1, %v1771_v46  ;;  %2224 = vmatprep.subr.bf16.mxu0 %v2530_v1 }
 0xbf7   :  { %2226 = vmatpush3.bf16.msra.mxu0 %v2645_v6  ;;  %2075 = vmatprep.mubr.msk.f32.mxu0 %vm2531_vm0, %v2532_v2 }
 0xbf8   :  { %2227 = vmatprep.subr.bf16.mxu0 %v2530_v1 }
 0xbfb   :  { %2229 = vmatpush3.bf16.msra.mxu0 %v2648_v9 }
 0xbfc   :  { %2230 = vmatprep.subr.bf16.mxu0 %v2530_v1 }
 0xcc9   :  { %v953_v47 = vpop.f32.mrb[4].mxu0 }
 0xcca   :  { %2337 = vtanh.f32 %v953_v47  ;;  %v2038_v48 = vpop.f32.mrb[5].mxu0  ;;  %v1774_v50 = vmul.f32 -1.442695, %v953_v47 }
 0xccc   :  { %2339 = vpow2.f32 %v1774_v50 }
 0xcd4   :  { %v2338_v49 = vpop.eup %2337 }
 0xcd5   :  { %966 = vrot.lane.b32.xlu1 %v2338_v49, %s2533_s4 }
 0xcd6   :  { %v2340_v51 = vpop.eup %2339 }
 0xcd7   :  { %v960_v52 = vadd.f32 1.0, %v2340_v51 }
 0xcd9   :  { %2341 = vrcp.f32 %v960_v52 }
 0xce3   :  { %v2342_v53 = vpop.eup %2341 }
 0xce4   :  { %v964_v57 = vmul.f32 %v2342_v53, %v796_v40 }
 0xd47   :  { %v967_v54 = vpop.permute.xlu1 %966 }
 0xd48   :  { %v969_v55 = vmul.f32 %v2342_v53, %v967_v54 }
 0xd4a   :  { %971 = vrot.lane.b32.xlu1 %v969_v55, %s2534_s7 }
 0xdbc   :  { %v972_v59 = vpop.permute.xlu1 %971 }
 0xdbd   :  { %v974_v60 = vadd.f32 %v972_v59, %v964_v57 }
 0xdbf   :  { %2343 = vtanh.f32 %v974_v60 }
 0xdc9   :  { %v2344_v61 = vpop.eup %2343 }
 0xdca   :  { %977 = vrot.lane.b32.xlu0 %v2344_v61, %s2533_s4 }
 0xdce   :  { %982 = vperm.xlu0 %2302, %v2642_v3  }
 0xdd2   :  { %2303 = vset.pattern.permute.xlu0 %v2540_v20 }
 0xe3c   :  { %v978_v62 = vpop.permute.xlu0 %977 }
 0xe3d   :  { %v2803_v63 = vmul.f32 %v2342_v53, %v978_v62 }
 0xe3f   :  { %988 = vrot.lane.b32.xlu1 %v2803_v63, %s2534_s7 }
 0xe4d   :  { %v983_v4 = vpop.permute.xlu0 %982 }
 0xe4e   :  { %vm984_vm8 = vcmp.eq.s32.totalorder %v983_v4, %v2676_v21 }
 0xe4f   :  { %v1775_v5 = vsel %vm984_vm8, 1.0, %v2532_v2 }
 0xeb1   :  { %v989_v0 = vpop.permute.xlu1 %988 }
 0xeb2   :  { %2048 = vmatmul.mubr.msk.f32.vlgmr.msra.gmra.mrb[4].mxu1 %vm97_vm3, %v989_v0 }
 0xeb3   :  { %2217 = vmatpush3.bf16.msra.mxu1 %v2654_v12  ;;  %2064 = vmatprep.mubr.msk.f32.mxu1 %vm2531_vm0, %v2532_v2 }
 0xeb4   :  { %2218 = vmatprep.subr.bf16.mxu1 %v2530_v1 }
 0xeb7   :  { %2220 = vmatpush3.bf16.msra.mxu1 %v2661_v15 }
 0xeb8   :  { %2221 = vmatprep.subr.bf16.mxu1 %v2530_v1 }
 0xebb   :  { %2223 = vmatpush3.bf16.msra.mxu1 %v2667_v18 }
 0xebc   :  { %2062 = vmatprep.subr.mxu1 %v2532_v2 }
 0xebf   :  { %2063 = vmatpush3.msra.mxu1 %v2672_v19 }
 0xec0   :  { %2065 = vmatmul.mubr.msk.f32.vlgmr.msra.gmra.mrb[4].mxu1 %vm171_vm1, %v1775_v5  ;;  %2239 = vmatprep.subr.bf16.mxu1 %v2530_v1 }
 0xec1   :  { %2241 = vmatpush3.bf16.msra.mxu1 %v2645_v6  ;;  %2103 = vmatprep.mubr.msk.f32.mxu1 %vm2531_vm0, %v2532_v2 }
 0xec2   :  { %2242 = vmatprep.subr.bf16.mxu1 %v2530_v1 }
 0xec5   :  { %2244 = vmatpush3.bf16.msra.mxu1 %v2648_v9 }
 0xec6   :  { %2245 = vmatprep.subr.bf16.mxu1 %v2530_v1 }
 0xf93   :  { %v1131_v7 = vpop.f32.mrb[4].mxu1 }
 0xf94   :  { %2345 = vtanh.f32 %v1131_v7  ;;  %v2066_v8 = vpop.f32.mrb[5].mxu1  ;;  %v1778_v11 = vmul.f32 -1.442695, %v1131_v7 }
 0xf96   :  { %2347 = vpow2.f32 %v1778_v11 }
 0xf9e   :  { %v2346_v10 = vpop.eup %2345 }
 0xf9f   :  { %1144 = vrot.lane.b32.xlu1 %v2346_v10, %s2533_s4 }
 0xfa0   :  { %v2348_v13 = vpop.eup %2347 }
 0xfa1   :  { %v1138_v14 = vadd.f32 1.0, %v2348_v13 }
 0xfa3   :  { %2349 = vrcp.f32 %v1138_v14 }
 0xfad   :  { %v2350_v6 = vpop.eup %2349 }
 0xfae   :  { %v1142_v9 = vmul.f32 %v2350_v6, %v974_v60 }
0x1011   :  { %v1145_v16 = vpop.permute.xlu1 %1144 }
0x1012   :  { %v1147_v17 = vmul.f32 %v2350_v6, %v1145_v16 }
0x1014   :  { %1149 = vrot.lane.b32.xlu1 %v1147_v17, %s2534_s7 }
0x1086   :  { %v1150_v22 = vpop.permute.xlu1 %1149 }
0x1087   :  { %v1152_v24 = vadd.f32 %v1150_v22, %v1142_v9 }
0x1089   :  { %2351 = vtanh.f32 %v1152_v24 }
0x1093   :  { %v2352_v25 = vpop.eup %2351 }
0x1094   :  { %1155 = vrot.lane.b32.xlu0 %v2352_v25, %s2533_s4 }
0x1098   :  { %1160 = vperm.xlu0 %2303, %v2642_v3  }
0x109c   :  { %2304 = vset.pattern.permute.xlu0 %v2541_v41 }
0x1106   :  { %v1156_v26 = vpop.permute.xlu0 %1155 }
0x1107   :  { %v2831_v27 = vmul.f32 %v2350_v6, %v1156_v26 }
0x1109   :  { %1166 = vrot.lane.b32.xlu1 %v2831_v27, %s2534_s7 }
0x1117   :  { %v1161_v29 = vpop.permute.xlu0 %1160 }
0x1118   :  { %vm1162_vm9 = vcmp.eq.s32.totalorder %v1161_v29, %v2676_v21 }
0x1119   :  { %v1779_v30 = vsel %vm1162_vm9, 1.0, %v2532_v2 }
0x117b   :  { %v1167_v28 = vpop.permute.xlu1 %1166 }
0x117c   :  { %2076 = vmatmul.mubr.msk.f32.vlgmr.msra.gmra.mrb[6].mxu0 %vm97_vm3, %v1167_v28 }
0x117d   :  { %2232 = vmatpush3.bf16.msra.mxu0 %v2654_v12  ;;  %2092 = vmatprep.mubr.msk.f32.mxu0 %vm2531_vm0, %v2532_v2 }
0x117e   :  { %2233 = vmatprep.subr.bf16.mxu0 %v2530_v1 }
0x1181   :  { %2235 = vmatpush3.bf16.msra.mxu0 %v2661_v15 }
0x1182   :  { %2236 = vmatprep.subr.bf16.mxu0 %v2530_v1 }
0x1185   :  { %2238 = vmatpush3.bf16.msra.mxu0 %v2667_v18 }
0x1186   :  { %2090 = vmatprep.subr.mxu0 %v2532_v2 }
0x1189   :  { %2091 = vmatpush3.msra.mxu0 %v2672_v19 }
0x118a   :  { %2093 = vmatmul.mubr.msk.f32.vlgmr.msra.gmra.mrb[6].mxu0 %vm171_vm1, %v1779_v30  ;;  %2254 = vmatprep.subr.bf16.mxu0 %v2530_v1 }
0x118b   :  { %2131 = vmatprep.mubr.msk.f32.mxu0 %vm2531_vm0, %v2532_v2 }
0x125d   :  { %v1309_v31 = vpop.f32.mrb[6].mxu0 }
0x125e   :  { %2353 = vtanh.f32 %v1309_v31  ;;  %v2094_v32 = vpop.f32.mrb[7].mxu0  ;;  %v1782_v34 = vmul.f32 -1.442695, %v1309_v31 }
0x1260   :  { %2355 = vpow2.f32 %v1782_v34 }
0x1268   :  { %v2354_v33 = vpop.eup %2353 }
0x1269   :  { %1322 = vrot.lane.b32.xlu1 %v2354_v33, %s2533_s4 }
0x126a   :  { %v2356_v35 = vpop.eup %2355 }
0x126b   :  { %v1316_v36 = vadd.f32 1.0, %v2356_v35 }
0x126d   :  { %2357 = vrcp.f32 %v1316_v36 }
0x1277   :  { %v2358_v37 = vpop.eup %2357 }
0x1278   :  { %v1320_v42 = vmul.f32 %v2358_v37, %v1152_v24 }
0x12db   :  { %v1323_v38 = vpop.permute.xlu1 %1322 }
0x12dc   :  { %v1325_v40 = vmul.f32 %v2358_v37, %v1323_v38 }
0x12de   :  { %1327 = vrot.lane.b32.xlu1 %v1325_v40, %s2534_s7 }
0x1350   :  { %v1328_v44 = vpop.permute.xlu1 %1327 }
0x1351   :  { %v1330_v45 = vadd.f32 %v1328_v44, %v1320_v42  ;;  %v1652_v44 = vld [vmem:[#allocation8] sm:$0xff] }
0x1353   :  { %2359 = vtanh.f32 %v1330_v45 }
0x135d   :  { %v2360_v46 = vpop.eup %2359 }
0x135e   :  { %1333 = vrot.lane.b32.xlu0 %v2360_v46, %s2533_s4  ;;  %v1654_v46 = vld [vmem:[#allocation8 + $0x10] sm:$0xff] }
0x1362   :  { %1338 = vperm.xlu0 %2304, %v2642_v3  }
0x13d0   :  { %v1334_v47 = vpop.permute.xlu0 %1333 }
0x13d1   :  { %v2855_v48 = vmul.f32 %v2358_v37, %v1334_v47 }
0x13d3   :  { %1344 = vrot.lane.b32.xlu1 %v2855_v48, %s2534_s7 }
0x13e1   :  { %v1339_v50 = vpop.permute.xlu0 %1338 }
0x13e2   :  { %vm1340_vm10 = vcmp.eq.s32.totalorder %v1339_v50, %v2676_v21 }
0x13e3   :  { %v1783_v3 = vsel %vm1340_vm10, 1.0, %v2532_v2 }
0x1445   :  { %v1345_v49 = vpop.permute.xlu1 %1344 }
0x1446   :  { %2104 = vmatmul.mubr.msk.f32.vlgmr.msra.gmra.mrb[6].mxu1 %vm97_vm3, %v1345_v49  ;;  %v1655_v49 = vld [vmem:[#allocation8 + $0x18] sm:$0xff] }
0x1447   :  { %2247 = vmatpush3.bf16.msra.mxu1 %v2654_v12  ;;  %2120 = vmatprep.mubr.msk.f32.mxu1 %vm2531_vm0, %v2532_v2  ;;  %v2258_v50 = vpack.c.bf16 %v1655_v49, %v1654_v46 }
0x1448   :  { %2248 = vmatprep.subr.bf16.mxu1 %v2530_v1 }
0x144b   :  { %2250 = vmatpush3.bf16.msra.mxu1 %v2661_v15 }
0x144c   :  { %2251 = vmatprep.subr.bf16.mxu1 %v2530_v1 }
0x144f   :  { %2253 = vmatpush3.bf16.msra.mxu1 %v2667_v18 }
0x1450   :  { %2118 = vmatprep.subr.mxu1 %v2532_v2  ;;  %v1787_v2 = vld [vmem:[%s2933_s3] ss:$0 sm:$0xff] }
0x1453   :  { %2119 = vmatpush3.msra.mxu1 %v2672_v19 }
0x1454   :  { %2121 = vmatmul.mubr.msk.f32.vlgmr.msra.gmra.mrb[6].mxu1 %vm171_vm1, %v1783_v3 }
0x1527   :  { %v1487_v12 = vpop.f32.mrb[6].mxu1 }
0x1528   :  { %2361 = vtanh.f32 %v1487_v12  ;;  %v2122_v51 = vpop.f32.mrb[7].mxu1  ;;  %v1786_v15 = vmul.f32 -1.442695, %v1487_v12 }
0x152a   :  { %2363 = vpow2.f32 %v1786_v15 }
0x1532   :  { %v2362_v52 = vpop.eup %2361 }
0x1533   :  { %1500 = vrot.lane.b32.xlu1 %v2362_v52, %s2533_s4 }
0x1534   :  { %v2364_v53 = vpop.eup %2363 }
0x1535   :  { %v1494_v21 = vadd.f32 1.0, %v2364_v53 }
0x1537   :  { %2365 = vrcp.f32 %v1494_v21 }
0x1538   :  { %2367 = vtanh.f32 %v2719_v58 }
0x1539   :  { %2369 = vtanh.f32 %v2775_v43 }
0x153a   :  { %2371 = vtanh.f32 %v2831_v27 }
0x1541   :  { %v2366_v18 = vpop.eup %2365 }
0x1542   :  { %v1498_v19 = vmul.f32 %v2366_v18, %v1330_v45  ;;  %v2368_v59 = vpop.eup %2367  ;;  %v1653_v45 = vld [vmem:[#allocation8 + $0x8] sm:$0xff] }
0x1543   :  { %v2370_v62 = vpop.eup %2369  ;;  %v2255_v47 = vpack.c.bf16 %v1653_v45, %v1652_v44 }
0x1544   :  { %v2372_v4 = vpop.eup %2371 }
0x1545   :  { %2256 = vmatpush3.bf16.msra.mxu0 %v2255_v47 }
0x1546   :  { %2257 = vmatprep.subr.bf16.mxu0 %v2530_v1 }
0x1549   :  { %2259 = vmatpush3.bf16.msra.mxu0 %v2258_v50 }
0x15a5   :  { %v1501_v54 = vpop.permute.xlu1 %1500 }
0x15a6   :  { %v1503_v55 = vmul.f32 %v2366_v18, %v1501_v54 }
0x15a8   :  { %1505 = vrot.lane.b32.xlu1 %v1503_v55, %s2534_s7 }
0x15ac   :  { %1522 = vrot.lane.b32.xlu1 %v1787_v2, %s2542_s22 }
0x161a   :  { %v1506_v56 = vpop.permute.xlu1 %1505 }
0x161b   :  { %v1508_v57 = vadd.f32 %v1506_v56, %v1498_v19 }
0x161d   :  { %2373 = vtanh.f32 %v1508_v57 }
0x161e   :  { %v1523_v60 = vpop.permute.xlu1 %1522  ;;  %2375 = vtanh.f32 %v2691_v39 }
0x161f   :  { %v1534_v61 = vmul.f32 %v2368_v59, %v1523_v60  ;;  %2377 = vtanh.f32 %v2747_v23  ;;  %v1552_v0 = vmul.f32 %v2370_v62, %v1523_v60  ;;  %v1570_v7 = vmul.f32 %v2372_v4, %v1523_v60 }
0x1620   :  { %2379 = vtanh.f32 %v2803_v63 }
0x1621   :  { %1536 = vrot.lane.b32.xlu1 %v1534_v61, %s2534_s7  ;;  %2381 = vtanh.f32 %v2855_v48 }
0x1625   :  { %1554 = vrot.lane.b32.xlu1 %v1552_v0, %s2534_s7 }
0x1627   :  { %v2374_v5 = vpop.eup %2373 }
0x1628   :  { %1511 = vrot.lane.b32.xlu0 %v2374_v5, %s2533_s4  ;;  %v2376_v8 = vpop.eup %2375 }
0x1629   :  { %1572 = vrot.lane.b32.xlu1 %v1570_v7, %s2534_s7  ;;  %v1525_v10 = vmul.f32 %v2376_v8, %v1523_v60  ;;  %v2378_v11 = vpop.eup %2377 }
0x162a   :  { %v1543_v13 = vmul.f32 %v2378_v11, %v1523_v60  ;;  %v2380_v14 = vpop.eup %2379 }
0x162b   :  { %v1561_v6 = vmul.f32 %v2380_v14, %v1523_v60  ;;  %v2382_v16 = vpop.eup %2381 }
0x162c   :  { %1527 = vrot.lane.b32.xlu0 %v1525_v10, %s2534_s7  ;;  %v1579_v17 = vmul.f32 %v2382_v16, %v1523_v60 }
0x1630   :  { %1545 = vrot.lane.b32.xlu0 %v1543_v13, %s2534_s7 }
0x1634   :  { %1563 = vrot.lane.b32.xlu0 %v1561_v6, %s2534_s7 }
0x1638   :  { %1581 = vrot.lane.b32.xlu0 %v1579_v17, %s2534_s7 }
0x1693   :  { %v1537_v22 = vpop.permute.xlu1 %1536 }
0x1694   :  { %v1539_v36 = vsel %vm97_vm3, %v1537_v22, 0.0 }
0x1697   :  { %v1555_v26 = vpop.permute.xlu1 %1554 }
0x1698   :  { %v1557_v31 = vsel %vm97_vm3, %v1555_v26, 0.0 }
0x169a   :  { %v1512_v20 = vpop.permute.xlu0 %1511 }
0x169b   :  { %v2892_v9 = vmul.f32 %v2366_v18, %v1512_v20  ;;  %v1573_v32 = vpop.permute.xlu1 %1572 }
0x169c   :  { %v1575_v34 = vsel %vm97_vm3, %v1573_v32, 0.0 }
0x169d   :  { %2383 = vtanh.f32 %v2892_v9 }
0x169e   :  { %v1528_v24 = vpop.permute.xlu0 %1527 }
0x169f   :  { %v1530_v25 = vsel %vm97_vm3, %v1528_v24, 0.0 }
0x16a0   :  { %1531 = vadd.xlane.f32.xlu0 %v1530_v25 }
0x16a2   :  { %v1546_v28 = vpop.permute.xlu0 %1545 }
0x16a3   :  { %v1548_v29 = vsel %vm97_vm3, %v1546_v28, 0.0 }
0x16a4   :  { %1549 = vadd.xlane.f32.xlu0 %v1548_v29 }
0x16a6   :  { %v1564_v35 = vpop.permute.xlu0 %1563 }
0x16a7   :  { %v2384_v30 = vpop.eup %2383  ;;  %v1566_v37 = vsel %vm97_vm3, %v1564_v35, 0.0 }
0x16a8   :  { %1558 = vadd.xlane.f32.xlu0 %v1557_v31  ;;  %v1588_v33 = vmul.f32 %v2384_v30, %v1523_v60 }
0x16aa   :  { %1590 = vrot.lane.b32.xlu1 %v1588_v33, %s2534_s7  ;;  %v1582_v38 = vpop.permute.xlu0 %1581 }
0x16ab   :  { %v1584_v40 = vsel %vm97_vm3, %v1582_v38, 0.0 }
0x16ac   :  { %1576 = vadd.xlane.f32.xlu0 %v1575_v34 }
0x16ce   :  { %1540 = vadd.xlane.f32.xlu1 %v1539_v36 }
0x16d2   :  { %1567 = vadd.xlane.f32.xlu1 %v1566_v37 }
0x16d6   :  { %1585 = vadd.xlane.f32.xlu1 %v1584_v40 }
0x171c   :  { %v1591_v41 = vpop.permute.xlu1 %1590 }
0x171d   :  { %v1593_v42 = vsel %vm97_vm3, %v1591_v41, 0.0 }
0x171e   :  { %1594 = vadd.xlane.f32.xlu0 %v1593_v42 }
0x172d   :  { %v1532_v3 = vpop.xlane.xlu0 %1531 }
0x1731   :  { %v1550_v12 = vpop.xlane.xlu0 %1549 }
0x1735   :  { %v1559_v52 = vpop.xlane.xlu0 %1558 }
0x1736   :  { %v1597_v55 = vmax.f32 %v1550_v12, %v1559_v52 }
0x1739   :  { %v1577_v53 = vpop.xlane.xlu0 %1576 }
0x175b   :  { %v1541_v51 = vpop.xlane.xlu1 %1540 }
0x175c   :  { %v1596_v21 = vmax.f32 %v1532_v3, %v1541_v51 }
0x175e   :  { %v1600_v56 = vmax.f32 %v1596_v21, %v1597_v55 }
0x175f   :  { %v1568_v15 = vpop.xlane.xlu1 %1567 }
0x1760   :  { %v1598_v2 = vmax.f32 %v1568_v15, %v1577_v53 }
0x1763   :  { %v1586_v18 = vpop.xlane.xlu1 %1585 }
0x17ab   :  { %v1595_v54 = vpop.xlane.xlu0 %1594 }
0x17ac   :  { %v1599_v19 = vmax.f32 %v1586_v18, %v1595_v54 }
0x17ae   :  { %v1601_v57 = vmax.f32 %v1598_v2, %v1599_v19 }
0x17b0   :  { %v1602_v59 = vmax.f32 %v1600_v56, %v1601_v57 }
0x17b2   :  { %v1603_v60 = vsub.f32 %v1532_v3, %v1602_v59  ;;  %v1606_v61 = vsub.f32 %v1541_v51, %v1602_v59  ;;  %v1609_v62 = vsub.f32 %v1550_v12, %v1602_v59  ;;  %v1612_v1 = vsub.f32 %v1559_v52, %v1602_v59 }
0x17b3   :  { %v1615_v0 = vsub.f32 %v1568_v15, %v1602_v59  ;;  %v1618_v4 = vsub.f32 %v1577_v53, %v1602_v59  ;;  %v1621_v10 = vsub.f32 %v1586_v18, %v1602_v59  ;;  %v1624_v13 = vsub.f32 %v1595_v54, %v1602_v59 }
0x17b4   :  { %v1604_v5 = vmul.f32 1.442695, %v1603_v60  ;;  %v1607_v7 = vmul.f32 1.442695, %v1606_v61  ;;  %v1610_v8 = vmul.f32 1.442695, %v1609_v62 }
0x17b5   :  { %v1613_v11 = vmul.f32 1.442695, %v1612_v1  ;;  %v1616_v14 = vmul.f32 1.442695, %v1615_v0  ;;  %v1619_v6 = vmul.f32 1.442695, %v1618_v4 }
0x17b6   :  { %2385 = vpow2.f32 %v1604_v5  ;;  %v1622_v16 = vmul.f32 1.442695, %v1621_v10  ;;  %v1625_v17 = vmul.f32 1.442695, %v1624_v13 }
0x17b7   :  { %2387 = vpow2.f32 %v1607_v7 }
0x17b8   :  { %2389 = vpow2.f32 %v1610_v8 }
0x17b9   :  { %2391 = vpow2.f32 %v1613_v11 }
0x17ba   :  { %2393 = vpow2.f32 %v1616_v14 }
0x17bb   :  { %2395 = vpow2.f32 %v1619_v6 }
0x17bc   :  { %2397 = vpow2.f32 %v1622_v16 }
0x17bd   :  { %2399 = vpow2.f32 %v1625_v17 }
0x17c0   :  { %v2386_v20 = vpop.eup %2385 }
0x17c1   :  { %v2388_v22 = vpop.eup %2387  ;;  %v1635_v36 = vmul.f32 %v2386_v20, %v2691_v39 }
0x17c2   :  { %v2390_v24 = vpop.eup %2389  ;;  %v1627_v28 = vadd.f32 %v2388_v22, %v2386_v20  ;;  %v1636_v38 = vmul.f32 %v2388_v22, %v2719_v58 }
0x17c3   :  { %v2392_v25 = vpop.eup %2391  ;;  %v1637_v40 = vmul.f32 %v2390_v24, %v2747_v23 }
0x17c4   :  { %v2394_v26 = vpop.eup %2393  ;;  %v1628_v29 = vadd.f32 %v2392_v25, %v2390_v24  ;;  %v1638_v41 = vmul.f32 %v2392_v25, %v2775_v43  ;;  %v1643_v49 = vadd.f32 %v1636_v38, %v1635_v36 }
0x17c5   :  { %v2396_v30 = vpop.eup %2395  ;;  %v1639_v42 = vmul.f32 %v2394_v26, %v2803_v63 }
0x17c6   :  { %v2398_v31 = vpop.eup %2397  ;;  %v1629_v32 = vadd.f32 %v2396_v30, %v2394_v26  ;;  %v1631_v35 = vadd.f32 %v1628_v29, %v1627_v28  ;;  %v1640_v44 = vmul.f32 %v2396_v30, %v2831_v27  ;;  %v1644_v50 = vadd.f32 %v1638_v41, %v1637_v40  ;;  %v1788_v27 = vld [vmem:[%s2935_s5] ss:$0 sm:$0xff] }
0x17c7   :  { %v2400_v33 = vpop.eup %2399  ;;  %v1641_v45 = vmul.f32 %v2398_v31, %v2855_v48 }
0x17c8   :  { %v1630_v34 = vadd.f32 %v2400_v33, %v2398_v31  ;;  %v1642_v46 = vmul.f32 %v2400_v33, %v2892_v9  ;;  %v1645_v39 = vadd.f32 %v1640_v44, %v1639_v42  ;;  %v1647_v12 = vadd.f32 %v1644_v50, %v1643_v49 }
0x17ca   :  { %v1632_v37 = vadd.f32 %v1630_v34, %v1629_v32  ;;  %v1646_v3 = vadd.f32 %v1642_v46, %v1641_v45 }
0x17cc   :  { %v1633_v47 = vadd.f32 %v1632_v37, %v1631_v35  ;;  %v1648_v58 = vadd.f32 %v1646_v3, %v1645_v39 }
0x17ce   :  { %2401 = vrcp.f32 %v1633_v47  ;;  %v1649_v51 = vadd.f32 %v1648_v58, %v1647_v12 }
0x17d8   :  { %v2402_v23 = vpop.eup %2401 }
0x17d9   :  { %v1650_v52 = vmul.f32 %v2402_v23, %v1649_v51 }
0x17db   :  { %2403 = vtanh.f32 %v1650_v52 }
0x17e5   :  { %v2404_v43 = vpop.eup %2403 }
0x17e6   :  { %1664 = vrot.lane.b32.xlu1 %v2404_v43, %s2534_s7 }
0x1858   :  { %v1665_v63 = vpop.permute.xlu1 %1664 }
0x1859   :  { %2132 = vmatmul.mubr.msk.f32.vlgmr.msra.gmra.mrb[8].mxu0 %vm97_vm3, %v1665_v63 }
0x192c   :  { %v1734_v48 = vpop.f32.mrb[8].mxu0 }
0x192d   :  { %v1735_v9 = vadd.f32 %v1788_v27, %v1734_v48  ;;  %v2133_v15 = vpop.f32.mrb[9].mxu0 }
0x192f   :  { %1738 = vst [vmem:[#allocation10] sm:$0xff] %v1735_v9 }
0x1930   :  { %2504 = shalt.err (!%p2501_p8)
}
0x1931   :  { %s2505_s29 = scalar_lea.hbm %s2936_s6, 128 }
0x1932   :  { %p2506_p9 = scmp.ne.s32.totalorder %s2936_s6, %s2505_s29  ;;  %p2509_p10 = scmp.lt.u32.totalorder %s2505_s29, %s2936_s6 }
0x1934   :  { %p2511_p11 = pnand %p2509_p10, %p2506_p9 }
0x1936   :  { %2514 = shalt.err (!%p2511_p11)
}
0x1937   :  { %1748 = dma.vmem_to_hbm [thread:$0]  %s1746_s25, 128, %s2936_s6, [#allocation4]  }
0x1938   :  { %2521 = dma.done.wait [#allocation4], 128  }
0x1939   :  { %2522 = vsyncadd [#allocation4], 4294967168 }
0x193a   :  { %1752 = vsyncpa [#allocation3], 1 }
0x193b   :  { %1753 = vsyncpa [#allocation6], 1 }
0x193c   :  { %1754 = vsyncpa [#allocation9], 1 }
0x193d   :  { %1755 = vsyncpa [#allocation4], 1 }

</bundles_post_ra>
